<compile_context>
chip_gen: v5e
topology: v5e:2x2
jax: 0.10.0
libtpu: 0.0.40
codegen_flags: <defaults>
</compile_context>

<pallas_src>
import functools

import numpy as np
import jax
import jax.numpy as jnp
from jax.experimental import pallas as pl
from jax.experimental.pallas import tpu as pltpu


def _interp_matrix(out_size, in_size):
    """Row-stochastic 1-D bilinear interpolation matrix, align_corners=True."""
    if in_size == 1:
        return np.ones((out_size, 1), np.float32)
    src = np.arange(out_size, dtype=np.float64) * (in_size - 1) / (out_size - 1)
    lo = np.clip(np.floor(src).astype(np.int64), 0, in_size - 2)
    frac = (src - lo).astype(np.float32)
    A = np.zeros((out_size, in_size), np.float32)
    A[np.arange(out_size), lo] += 1.0 - frac
    A[np.arange(out_size), lo + 1] += frac
    return A


def _conv_block_up_kernel(x_ref, w_ref, u_ref, o_ref, p_ref, *, H, W, cin, eps):
    # x_ref : (1, Cin, H*W)        flattened input tile (one batch element)
    # w_ref : (Cout, 9*Cin + 1)    conv weight, im2col-flattened, bias in last col
    # u_ref : (H*W, 4*H*W)         kron(Ah, Aw)^T bilinear upsample matrix
    # o_ref : (1, Cout, 4*H*W)     channel-major (NCHW-order) output
    # p_ref : (9*Cin + 1, H*W)     VMEM scratch for the im2col matrix
    HW = H * W
    x = x_ref[0]                                     # (Cin, H*W), f32

    # Width-border masks for the 3x3 stencil (the height direction is handled
    # by clipping the flat shift range below).
    col = jax.lax.broadcasted_iota(jnp.int32, (1, HW), 1) % W
    x_kj = [
        jnp.where(col == W - 1, 0.0, x),             # taps with kj == 0 (w-1)
        x,                                           # taps with kj == 1
        jnp.where(col == 0, 0.0, x),                 # taps with kj == 2 (w+1)
    ]

    # Build im2col P (9*Cin + 1, H*W): row block t holds the input shifted by
    # the stencil offset (ki-1, kj-1); the final row is ones so the conv bias
    # folds into the weight matrix.  Un-stored regions stay zero (halo).
    p_ref[...] = jnp.zeros_like(p_ref)
    for ki in range(3):
        for kj in range(3):
            t = ki * 3 + kj
            s = (ki - 1) * W + (kj - 1)              # flat shift of this tap
            if s >= 0:
                dst, src, n = 0, s, HW - s
            else:
                dst, src, n = -s, 0, HW + s
            # Static slices: P[t*cin+c, p] = x[c, p + s] (zero outside range).
            p_ref[t * cin:(t + 1) * cin, dst:dst + n] = x_kj[kj][:, src:src + n]
    p_ref[9 * cin:9 * cin + 1, :] = jnp.ones((1, HW), jnp.float32)

    # conv3x3 + bias: a single MXU matmul with a lane-dense (Cout, H*W) result.
    acc = jnp.dot(w_ref[...], p_ref[...], preferred_element_type=jnp.float32)

    # InstanceNorm2d (affine=False, biased variance), one-pass statistics,
    # reduction along the lane axis per channel row.
    inv_hw = 1.0 / float(HW)
    s1 = jnp.sum(acc, axis=1, keepdims=True)
    s2 = jnp.sum(acc * acc, axis=1, keepdims=True)
    mean = s1 * inv_hw
    var = jnp.maximum(s2 * inv_hw - mean * mean, 0.0)
    y = (acc - mean) * jax.lax.rsqrt(var + eps)

    # ReLU.
    y = jnp.maximum(y, 0.0)

    # 2x bilinear upsample (align_corners=True) as one matmul; output is
    # (Cout, 2H*2W), already in NCHW order and lane-dense for the store.
    out = jnp.dot(y, u_ref[...], preferred_element_type=jnp.float32)
    o_ref[0] = out.astype(o_ref.dtype)


def conv_block_up(x_nchw, weight_oihw, bias, *, eps=1e-5):
    """ConvBlockUp forward (norm_type='instance', stride=1, upsample=True, dim=2).

    x_nchw: (N, Cin, H, W); weight_oihw: (Cout, Cin, 3, 3) [PyTorch layout];
    bias: (Cout,). Returns (N, Cout, 2H, 2W) in NCHW.
    """
    N, Cin, H, W = x_nchw.shape
    Cout = weight_oihw.shape[0]
    HW, HWu = H * W, 4 * H * W
    K = 9 * Cin + 1

    # Flatten spatial dims (cheap reshape; no padded HBM copy needed).
    x_flat = x_nchw.reshape(N, Cin, HW).astype(jnp.float32)

    # Conv weight -> (Cout, 9*Cin) matching the im2col tap order (ki*3+kj, c),
    # with the bias folded in as an extra column (paired with the ones row).
    w_flat = jnp.transpose(weight_oihw.astype(jnp.float32), (0, 2, 3, 1))
    w_flat = w_flat.reshape(Cout, 9 * Cin)
    w_flat = jnp.concatenate(
        [w_flat, bias.astype(jnp.float32).reshape(Cout, 1)], axis=1)

    # Combined 2x bilinear (align_corners=True) interpolation matrix.
    ah = _interp_matrix(2 * H, H)
    aw = _interp_matrix(2 * W, W)
    u = jnp.asarray(np.kron(ah, aw).T)               # (H*W, 4*H*W)

    out_flat = pl.pallas_call(
        functools.partial(_conv_block_up_kernel, H=H, W=W, cin=Cin, eps=eps),
        out_shape=jax.ShapeDtypeStruct((N, Cout, HWu), jnp.float32),
        grid_spec=pltpu.PrefetchScalarGridSpec(
            num_scalar_prefetch=0,
            grid=(N,),
            in_specs=[
                pl.BlockSpec((1, Cin, HW), lambda b: (b, 0, 0)),
                pl.BlockSpec((Cout, K), lambda b: (0, 0)),
                pl.BlockSpec((HW, HWu), lambda b: (0, 0)),
            ],
            out_specs=pl.BlockSpec((1, Cout, HWu), lambda b: (b, 0, 0)),
            scratch_shapes=[pltpu.VMEM((K, HW), jnp.float32)],
        ),
        # Batch elements are independent: "parallel" lets v7x's two
        # TensorCores split the grid; neutral on v5e/v6e.
        compiler_params=pltpu.CompilerParams(
            dimension_semantics=("parallel",)),
    )(x_flat, w_flat, u)

    # Free reshape: (N, Cout, 4*H*W) -> (N, Cout, 2H, 2W); no transpose needed.
    return out_flat.reshape(N, Cout, 2 * H, 2 * W)


def conv_block_up_ref(x_nchw, weight_oihw, bias, *, eps=1e-5):
    """Pure-JAX reference with identical semantics (sanity check)."""
    y = jax.lax.conv_general_dilated(
        x_nchw.astype(jnp.float32), weight_oihw.astype(jnp.float32),
        window_strides=(1, 1), padding='SAME',
        dimension_numbers=('NCHW', 'OIHW', 'NCHW'))
    y = y + bias.reshape(1, -1, 1, 1)
    mean = jnp.mean(y, axis=(2, 3), keepdims=True)
    var = jnp.mean((y - mean) ** 2, axis=(2, 3), keepdims=True)
    y = jnp.maximum((y - mean) * jax.lax.rsqrt(var + eps), 0.0)
    H, W = y.shape[2], y.shape[3]
    ah = jnp.asarray(_interp_matrix(2 * H, H))
    aw = jnp.asarray(_interp_matrix(2 * W, W))
    y = jnp.einsum('ih,nchw->nciw', ah, y)
    y = jnp.einsum('jw,nciw->ncij', aw, y)
    return y


if __name__ == "__main__":
    # ConvBlockUp(in_channels=4, out_channels=8, stride=1,
    #             norm_type='instance', upsample=True, dim=2)
    N, Cin, Cout, H, W = 2, 4, 8, 16, 16

    key = jax.random.PRNGKey(0)
    kx, kw, kb = jax.random.split(key, 3)
    x = jax.random.normal(kx, (N, Cin, H, W), jnp.float32)
    weight = 0.1 * jax.random.normal(kw, (Cout, Cin, 3, 3), jnp.float32)  # OIHW
    bias = 0.1 * jax.random.normal(kb, (Cout,), jnp.float32)

    out = jax.block_until_ready(conv_block_up(x, weight, bias))
    ref = jax.block_until_ready(conv_block_up_ref(x, weight, bias))

    assert out.shape == (N, Cout, 2 * H, 2 * W), out.shape
    np.testing.assert_allclose(np.asarray(out), np.asarray(ref),
                               rtol=2e-3, atol=2e-3)
    print("KERNEL_OK")
</pallas_src>

<mosaic_0001>
module attributes {stable_mosaic.version = 11 : i64} {
  func.func @_conv_block_up_kernel(%arg0: i32, %arg1: memref<1x4x256xf32, #tpu.memory_space<vmem>>, %arg2: memref<8x37xf32, #tpu.memory_space<vmem>>, %arg3: memref<256x1024xf32, #tpu.memory_space<vmem>>, %arg4: memref<1x8x1024xf32, #tpu.memory_space<vmem>>, %arg5: memref<37x256xf32, #tpu.memory_space<vmem>>) attributes {dimension_semantics = [#tpu.dimension_semantics<parallel>], iteration_bounds = array<i64: 2>, scalar_prefetch = 0 : i64, scratch_operands = 1 : i64, tpu.core_type = #tpu.core_type<tc>, window_params = [{transform_indices = @transform_0, window_bounds = array<i64: 1, 4, 256>}, {pipeline_mode = #tpu.pipeline_mode<synchronous>, transform_indices = @transform_1, window_bounds = array<i64: 8, 37>}, {pipeline_mode = #tpu.pipeline_mode<synchronous>, transform_indices = @transform_2, window_bounds = array<i64: 256, 1024>}, {transform_indices = @transform_3, window_bounds = array<i64: 1, 8, 1024>}]} {
    %c0 = arith.constant 0 : index
    %c0_0 = arith.constant 0 : index
    %c0_1 = arith.constant 0 : index
    %0 = vector.load %arg1[%c0, %c0_0, %c0_1] : memref<1x4x256xf32, #tpu.memory_space<vmem>>, vector<1x4x256xf32>
    %1 = vector.shape_cast %0 : vector<1x4x256xf32> to vector<4x256xf32>
    %2 = tpu.iota {dimensions = array<i32: 1>} : vector<1x256xi32>
    %c16_i32 = arith.constant 16 : i32
    %c0_i32 = arith.constant 0 : i32
    %3 = arith.cmpi eq, %c16_i32, %c0_i32 : i32
    %c1_i32 = arith.constant 1 : i32
    %4 = arith.select %3, %c1_i32, %c16_i32 : i32
    %5 = vector.broadcast %4 : i32 to vector<1x256xi32>
    %6 = arith.remsi %2, %5 : vector<1x256xi32>
    %c0_i32_2 = arith.constant 0 : i32
    %7 = vector.broadcast %c0_i32_2 : i32 to vector<1x256xi32>
    %8 = arith.cmpi ne, %6, %7 : vector<1x256xi32>
    %c0_i32_3 = arith.constant 0 : i32
    %9 = vector.broadcast %c0_i32_3 : i32 to vector<1x256xi32>
    %10 = arith.cmpi slt, %6, %9 : vector<1x256xi32>
    %c0_i32_4 = arith.constant 0 : i32
    %11 = arith.cmpi slt, %4, %c0_i32_4 : i32
    %12 = vector.broadcast %11 : i1 to vector<1x256xi1>
    %13 = vector.broadcast %12 : vector<1x256xi1> to vector<1x256xi1>
    %14 = arith.xori %10, %13 : vector<1x256xi1>
    %15 = arith.andi %14, %8 : vector<1x256xi1>
    %16 = vector.broadcast %4 : i32 to vector<1x256xi32>
    %17 = arith.addi %6, %16 : vector<1x256xi32>
    %18 = arith.select %15, %17, %6 : vector<1x256xi1>, vector<1x256xi32>
    %c15_i32 = arith.constant 15 : i32
    %19 = vector.broadcast %c15_i32 : i32 to vector<1x256xi32>
    %20 = arith.cmpi eq, %18, %19 : vector<1x256xi32>
    %cst = arith.constant 0.000000e+00 : f32
    %21 = vector.shape_cast %20 : vector<1x256xi1> to vector<1x256xi1>
    %22 = vector.broadcast %21 : vector<1x256xi1> to vector<4x256xi1>
    %23 = vector.broadcast %cst : f32 to vector<4x256xf32>
    %24 = arith.select %22, %23, %1 : vector<4x256xi1>, vector<4x256xf32>
    %c0_i32_5 = arith.constant 0 : i32
    %25 = vector.broadcast %c0_i32_5 : i32 to vector<1x256xi32>
    %26 = arith.cmpi eq, %18, %25 : vector<1x256xi32>
    %cst_6 = arith.constant 0.000000e+00 : f32
    %27 = vector.shape_cast %26 : vector<1x256xi1> to vector<1x256xi1>
    %28 = vector.broadcast %27 : vector<1x256xi1> to vector<4x256xi1>
    %29 = vector.broadcast %cst_6 : f32 to vector<4x256xf32>
    %30 = arith.select %28, %29, %1 : vector<4x256xi1>, vector<4x256xf32>
    %cst_7 = arith.constant 0.000000e+00 : f32
    %31 = vector.broadcast %cst_7 : f32 to vector<37x256xf32>
    %c0_8 = arith.constant 0 : index
    %c0_9 = arith.constant 0 : index
    %32 = vector.load %arg5[%c0_8, %c0_9] : memref<37x256xf32, #tpu.memory_space<vmem>>, vector<37x256xf32>
    tpu.vector_store %arg5[%c0_8, %c0_9], %31 {strides = array<i32>} : memref<37x256xf32, #tpu.memory_space<vmem>>, vector<37x256xf32>,
    %33 = vector.extract_strided_slice %24 {offsets = [0, 0], sizes = [4, 239], strides = [1, 1]} : vector<4x256xf32> to vector<4x239xf32>
    %c0_10 = arith.constant 0 : index
    %c17 = arith.constant 17 : index
    %34 = vector.load %arg5[%c0_10, %c17] : memref<37x256xf32, #tpu.memory_space<vmem>>, vector<4x239xf32>
    tpu.vector_store %arg5[%c0_10, %c17], %33 {strides = array<i32>} : memref<37x256xf32, #tpu.memory_space<vmem>>, vector<4x239xf32>,
    %35 = vector.extract_strided_slice %1 {offsets = [0, 0], sizes = [4, 240], strides = [1, 1]} : vector<4x256xf32> to vector<4x240xf32>
    %c4 = arith.constant 4 : index
    %c16 = arith.constant 16 : index
    %36 = vector.load %arg5[%c4, %c16] : memref<37x256xf32, #tpu.memory_space<vmem>>, vector<4x240xf32>
    tpu.vector_store %arg5[%c4, %c16], %35 {strides = array<i32>} : memref<37x256xf32, #tpu.memory_space<vmem>>, vector<4x240xf32>,
    %37 = vector.extract_strided_slice %30 {offsets = [0, 0], sizes = [4, 241], strides = [1, 1]} : vector<4x256xf32> to vector<4x241xf32>
    %c8 = arith.constant 8 : index
    %c15 = arith.constant 15 : index
    %38 = vector.load %arg5[%c8, %c15] : memref<37x256xf32, #tpu.memory_space<vmem>>, vector<4x241xf32>
    tpu.vector_store %arg5[%c8, %c15], %37 {strides = array<i32>} : memref<37x256xf32, #tpu.memory_space<vmem>>, vector<4x241xf32>,
    %39 = vector.extract_strided_slice %24 {offsets = [0, 0], sizes = [4, 255], strides = [1, 1]} : vector<4x256xf32> to vector<4x255xf32>
    %c12 = arith.constant 12 : index
    %c1 = arith.constant 1 : index
    %40 = vector.load %arg5[%c12, %c1] : memref<37x256xf32, #tpu.memory_space<vmem>>, vector<4x255xf32>
    tpu.vector_store %arg5[%c12, %c1], %39 {strides = array<i32>} : memref<37x256xf32, #tpu.memory_space<vmem>>, vector<4x255xf32>,
    %c16_11 = arith.constant 16 : index
    %c0_12 = arith.constant 0 : index
    %41 = vector.load %arg5[%c16_11, %c0_12] : memref<37x256xf32, #tpu.memory_space<vmem>>, vector<4x256xf32>
    tpu.vector_store %arg5[%c16_11, %c0_12], %1 {strides = array<i32>} : memref<37x256xf32, #tpu.memory_space<vmem>>, vector<4x256xf32>,
    %42 = vector.extract_strided_slice %30 {offsets = [0, 1], sizes = [4, 255], strides = [1, 1]} : vector<4x256xf32> to vector<4x255xf32>
    %c20 = arith.constant 20 : index
    %c0_13 = arith.constant 0 : index
    %43 = vector.load %arg5[%c20, %c0_13] : memref<37x256xf32, #tpu.memory_space<vmem>>, vector<4x255xf32>
    tpu.vector_store %arg5[%c20, %c0_13], %42 {strides = array<i32>} : memref<37x256xf32, #tpu.memory_space<vmem>>, vector<4x255xf32>,
    %44 = vector.extract_strided_slice %24 {offsets = [0, 15], sizes = [4, 241], strides = [1, 1]} : vector<4x256xf32> to vector<4x241xf32>
    %c24 = arith.constant 24 : index
    %c0_14 = arith.constant 0 : index
    %45 = vector.load %arg5[%c24, %c0_14] : memref<37x256xf32, #tpu.memory_space<vmem>>, vector<4x241xf32>
    tpu.vector_store %arg5[%c24, %c0_14], %44 {strides = array<i32>} : memref<37x256xf32, #tpu.memory_space<vmem>>, vector<4x241xf32>,
    %46 = vector.extract_strided_slice %1 {offsets = [0, 16], sizes = [4, 240], strides = [1, 1]} : vector<4x256xf32> to vector<4x240xf32>
    %c28 = arith.constant 28 : index
    %c0_15 = arith.constant 0 : index
    %47 = vector.load %arg5[%c28, %c0_15] : memref<37x256xf32, #tpu.memory_space<vmem>>, vector<4x240xf32>
    tpu.vector_store %arg5[%c28, %c0_15], %46 {strides = array<i32>} : memref<37x256xf32, #tpu.memory_space<vmem>>, vector<4x240xf32>,
    %48 = vector.extract_strided_slice %30 {offsets = [0, 17], sizes = [4, 239], strides = [1, 1]} : vector<4x256xf32> to vector<4x239xf32>
    %c32 = arith.constant 32 : index
    %c0_16 = arith.constant 0 : index
    %49 = vector.load %arg5[%c32, %c0_16] : memref<37x256xf32, #tpu.memory_space<vmem>>, vector<4x239xf32>
    tpu.vector_store %arg5[%c32, %c0_16], %48 {strides = array<i32>} : memref<37x256xf32, #tpu.memory_space<vmem>>, vector<4x239xf32>,
    %cst_17 = arith.constant 1.000000e+00 : f32
    %50 = vector.broadcast %cst_17 : f32 to vector<1x256xf32>
    %c36 = arith.constant 36 : index
    %c0_18 = arith.constant 0 : index
    %51 = vector.load %arg5[%c36, %c0_18] : memref<37x256xf32, #tpu.memory_space<vmem>>, vector<1x256xf32>
    tpu.vector_store %arg5[%c36, %c0_18], %50 {strides = array<i32>} : memref<37x256xf32, #tpu.memory_space<vmem>>, vector<1x256xf32>,
    %c0_19 = arith.constant 0 : index
    %c0_20 = arith.constant 0 : index
    %52 = vector.load %arg2[%c0_19, %c0_20] : memref<8x37xf32, #tpu.memory_space<vmem>>, vector<8x37xf32>
    %c0_21 = arith.constant 0 : index
    %c0_22 = arith.constant 0 : index
    %53 = vector.load %arg5[%c0_21, %c0_22] : memref<37x256xf32, #tpu.memory_space<vmem>>, vector<37x256xf32>
    %cst_23 = arith.constant dense<0.000000e+00> : vector<8x256xf32>
    %54 = tpu.matmul %52, %53, %cst_23 {dimension_numbers = #tpu.dot_dimension_numbers<[1], [0], [0], [1], [0, 0, 1, 1], [], []>} : vector<8x37xf32>, vector<37x256xf32>, vector<8x256xf32> -> vector<8x256xf32>
    %cst_24 = arith.constant dense<0.000000e+00> : vector<8xf32>
    %55 = vector.multi_reduction <add>, %54, %cst_24 [1] : vector<8x256xf32> to vector<8xf32>
    %56 = vector.shape_cast %55 : vector<8xf32> to vector<8x1xf32>
    %57 = arith.mulf %54, %54 : vector<8x256xf32>
    %cst_25 = arith.constant dense<0.000000e+00> : vector<8xf32>
    %58 = vector.multi_reduction <add>, %57, %cst_25 [1] : vector<8x256xf32> to vector<8xf32>
    %59 = vector.shape_cast %58 : vector<8xf32> to vector<8x1xf32>
    %cst_26 = arith.constant 3.906250e-03 : f32
    %60 = vector.broadcast %cst_26 : f32 to vector<8x1xf32>
    %61 = arith.mulf %56, %60 : vector<8x1xf32>
    %cst_27 = arith.constant 3.906250e-03 : f32
    %62 = vector.broadcast %cst_27 : f32 to vector<8x1xf32>
    %63 = arith.mulf %59, %62 : vector<8x1xf32>
    %64 = arith.mulf %61, %61 : vector<8x1xf32>
    %65 = arith.subf %63, %64 : vector<8x1xf32>
    %cst_28 = arith.constant 0.000000e+00 : f32
    %66 = vector.broadcast %cst_28 : f32 to vector<8x1xf32>
    %67 = arith.maximumf %65, %66 : vector<8x1xf32>
    %68 = vector.broadcast %61 : vector<8x1xf32> to vector<8x256xf32>
    %69 = arith.subf %54, %68 : vector<8x256xf32>
    %cst_29 = arith.constant 9.99999974E-6 : f32
    %70 = vector.broadcast %cst_29 : f32 to vector<8x1xf32>
    %71 = arith.addf %67, %70 : vector<8x1xf32>
    %72 = math.rsqrt %71 : vector<8x1xf32>
    %73 = vector.broadcast %72 : vector<8x1xf32> to vector<8x256xf32>
    %74 = arith.mulf %69, %73 : vector<8x256xf32>
    %cst_30 = arith.constant 0.000000e+00 : f32
    %75 = vector.broadcast %cst_30 : f32 to vector<8x256xf32>
    %76 = arith.maximumf %74, %75 : vector<8x256xf32>
    %c0_31 = arith.constant 0 : index
    %c0_32 = arith.constant 0 : index
    %77 = vector.load %arg3[%c0_31, %c0_32] : memref<256x1024xf32, #tpu.memory_space<vmem>>, vector<256x1024xf32>
    %cst_33 = arith.constant dense<0.000000e+00> : vector<8x1024xf32>
    %78 = tpu.matmul %76, %77, %cst_33 {dimension_numbers = #tpu.dot_dimension_numbers<[1], [0], [0], [1], [0, 0, 1, 1], [], []>} : vector<8x256xf32>, vector<256x1024xf32>, vector<8x1024xf32> -> vector<8x1024xf32>
    %c0_34 = arith.constant 0 : index
    %c0_35 = arith.constant 0 : index
    %c0_36 = arith.constant 0 : index
    %79 = vector.load %arg4[%c0_34, %c0_35, %c0_36] : memref<1x8x1024xf32, #tpu.memory_space<vmem>>, vector<1x8x1024xf32>
    %80 = vector.shape_cast %79 : vector<1x8x1024xf32> to vector<8x1024xf32>
    %81 = vector.shape_cast %78 : vector<8x1024xf32> to vector<1x8x1024xf32>
    tpu.vector_store %arg4[%c0_34, %c0_35, %c0_36], %81 {strides = array<i32>} : memref<1x8x1024xf32, #tpu.memory_space<vmem>>, vector<1x8x1024xf32>,
    return
  }
  func.func @transform_0(%arg0: i32) -> (i32, i32, i32) {
    %c0_i32 = arith.constant 0 : i32
    %c0_i32_0 = arith.constant 0 : i32
    %c0_i32_1 = arith.constant 0 : i32
    return %arg0, %c0_i32, %c0_i32_0 : i32, i32, i32
  }
  func.func @transform_1(%arg0: i32) -> (i32, i32) {
    %c0_i32 = arith.constant 0 : i32
    %c0_i32_0 = arith.constant 0 : i32
    %c0_i32_1 = arith.constant 0 : i32
    return %c0_i32, %c0_i32_0 : i32, i32
  }
  func.func @transform_2(%arg0: i32) -> (i32, i32) {
    %c0_i32 = arith.constant 0 : i32
    %c0_i32_0 = arith.constant 0 : i32
    %c0_i32_1 = arith.constant 0 : i32
    return %c0_i32, %c0_i32_0 : i32, i32
  }
  func.func @transform_3(%arg0: i32) -> (i32, i32, i32) {
    %c0_i32 = arith.constant 0 : i32
    %c0_i32_0 = arith.constant 0 : i32
    %c0_i32_1 = arith.constant 0 : i32
    return %arg0, %c0_i32, %c0_i32_0 : i32, i32, i32
  }
}

</mosaic_0001>

<bundles_post_ra>
// kernel: tpu_custom_call.1
= control target key start
LH: loop header
LB: loop body
LE: loop exit
PB: predicated region body
PF: predicated region fallthrough
CT: control target
= control target key end

     0   :  { %8 = vsyncpa [#allocation4], 0  ;;  %s1673_s0 = inlined_call_operand.hbm [shape: f32[2,4,256], index: 0, kind: input, shape index: {}]   ;;  %s1674_s1 = inlined_call_operand.hbm [shape: f32[8,37], index: 1, kind: input, shape index: {}]   ;;  %s1675_s2 = inlined_call_operand.hbm [shape: f32[256,1024], index: 2, kind: input, shape index: {}]   ;;  %s1676_s3 = inlined_call_operand.hbm [shape: f32[2,8,1024], index: 3, kind: output, shape index: {}]  }
   0x1   :  { %10 = vsyncpa [#allocation4 + $0x1], 0 }
   0x2   :  { %11 = vsyncpa [#allocation7], 0 }
   0x3   :  { %12 = vsyncpa [#allocation5], 0 }
   0x4   :  { %14 = vsyncpa [#allocation5 + $0x1], 0  ;;  %s1486_s12 = smov 0   ;;  %s1488_s13 = smov 0  }
   0x5   :  { %s1490_s14 = smov 0   ;;  %s1492_s15 = smov 0  }
   0x6 LB: > { %s1507_s16 = sadd.s32 4294967295, %s1450_s15   ;;  %s1185_s17 = sadd.s32 4294967294, %s1450_s15   ;;  %s1450_s15 = sphi %s1492_s15, %s1686_s15   ;;  %s1446_s14 = sphi %s1490_s14, %s1685_s14   ;;  %s1442_s13 = sphi %s1488_s13, %s1684_s13   ;;  %s1438_s12 = sphi %s1486_s12, %s1683_s12  }
   0x7   : > { %p40_p0 = scmp.ne.s32.totalorder %s1442_s13, %s1438_s12  ;;  %p41_p1 = scmp.eq.s32.totalorder %s1507_s16, 0 }
   0x8   : > { %p106_p2 = scmp.eq.s32.totalorder %s1507_s16, 1  ;;  %p112_p3 = scmp.eq.s32.totalorder %s1185_s17, 1 }
   0x9   : > { %p1516_p4 = por %p41_p1, %p40_p0  ;;  %p1186_p5 = scmp.ge.s32.totalorder %s1450_s15, 1 }
   0xa   : > { %p1521_p6 = por %p112_p3, %p40_p0  ;;  %p119_p7 = scmp.lt.s32.totalorder %s1450_s15, 3 }
   0xb   : > { %s131_s22 = sshll.u32 %s1674_s1, 4  ;;  %s1452_s24 = smov [#allocation6]   ;;  %s132_s22 = int_to_ptr.hbm [resolvable:$true] %s131_s22 }
   0xc   : > { %p1529_p8 = pnand %p1186_p5, %p119_p7  ;;  %s133_s25 = sshll.u32 %s1452_s24, 4  ;;  %s134_s25 = int_to_ptr.vmem [resolvable:$true] %s133_s25 }
   0xd   : > { %s142_s28 = sshll.u32 %s1675_s2, 4  ;;  %s1453_s29 = smov [#allocation8]   ;;  %s143_s28 = int_to_ptr.hbm [resolvable:$true] %s142_s28 }
   0xe   : > { %p1221_p10 = pneg %p1529_p8  ;;  %s144_s30 = sshll.u32 %s1453_s29, 4  ;;  %s145_s30 = int_to_ptr.vmem [resolvable:$true] %s144_s30 }
   0xf   : > { %s1454_s4 = smov 1024   ;;  %s1455_s5 = smov 64  }
  0x10   : > { %p1222_p11 = pnand %p1221_p10, %p41_p1  ;;  %s1542_s6 = sadd.s32 1, %s1450_s15  }
  0x11   : > { %s24_s7 = ssub.s32 %s1450_s15, %s1542_s6  ;;  %s27_s8 = sadd.s32 1, %s1446_s14 }
  0x12   : > { %1224 = dma.hbm_to_vmem [thread:$0]  (!%p1222_p11), %s132_s22, 128, %s134_s25, [#allocation7]  }
  0x13   : > { %1227 = dma.hbm_to_vmem [thread:$0]  (!%p1222_p11), %s143_s28, 32768, %s145_s30, [#allocation7], %s1454_s4, %s1454_s4, %s1455_s5  }
  0x14   : > { %p25_p12 = scmp.eq.s32.totalorder %s24_s7, 0  ;;  %p34_p13 = scmp.ne.s32.totalorder %s1446_s14, %s1442_s13 }
  0x15   : > { %p35_p0 = scmp.eq.s32.totalorder %s1450_s15, 0  ;;  %p1238_p7 = scmp.lt.s32.totalorder %s1450_s15, 2 }
  0x16   : > { %s1551_s9 = scalar_select %p25_p12, %s1446_s14, %s27_s8  }
  0x17   : > { %p36_p3 = por %p35_p0, %p34_p13  ;;  %p1555_p5 = por %p106_p2, %p34_p13 }
  0x18   : > { %s158_s11 = sand.u32 1, %s1446_s14   ;;  %s1207_s20 = sshll.u32 %s1450_s15, 3 }
  0x19   : > { %s1190_s17 = sshll.u32 %s158_s11, 3  ;;  %s167_s24 = scalar_lea.hbm %s1673_s0, %s1207_s20 }
  0x1a   : > { %s162_s25 = scalar_lea.vmem [#allocation3], %s1190_s17  ;;  %s169_s27 = sshll.u32 %s167_s24, 4  ;;  %s170_s27 = int_to_ptr.hbm [resolvable:$true] %s169_s27 }
  0x1b   : > { %s171_s26 = sshll.u32 %s162_s25, 4  ;;  %p1565_p10 = pnand %p1238_p7, %p36_p3  ;;  %s172_s26 = int_to_ptr.vmem [resolvable:$true] %s171_s26 }
  0x1c   : > { %s159_s29 = scalar_lea.sflag [#allocation4], %s158_s11  ;;  %s1350_s30 = sshra.s32 %s170_s27, 4  ;;  %s1351_s30 = int_to_ptr.hbm [resolvable:$true] %s1350_s30 }
  0x1d   : > { %s1352_s4 = scalar_lea.hbm %s1351_s30, 8  ;;  %p1354_p11 = pneg %p1565_p10 }
  0x1e   : > { %p1353_p2 = scmp.ne.s32.totalorder %s1351_s30, %s1352_s4  ;;  %s1357_s8 = scalar_lea.hbm %s1673_s0, 16 }
  0x1f   : > { %p1358_p0 = scmp.lt.s32.totalorder %s1351_s30, %s1673_s0  ;;  %p1359_p3 = scmp.lt.s32.totalorder %s1357_s8, %s1352_s4 }
  0x20   : > { %p1355_p12 = pnand %p1354_p11, %p1353_p2 }
  0x21   : > { %p1360_p7 = por %p1359_p3, %p1358_p0 }
  0x22   : > { %p1356_p13 = pneg %p1355_p12 }
  0x24   : > { %p1361_p9 = pnand %p1360_p7, %p1356_p13 }
  0x26   : > { %1364 = shalt.err (!%p1361_p9)
}
  0x27   : > { %1231 = dma.hbm_to_vmem [thread:$0]  (!%p1565_p10), %s170_s27, 128, %s172_s26, %s159_s29  }
  0x28   : > { %180 = sbr.rel (%p1529_p8) target bundleno = 715 (0x2cb), region = 32  ;;  %s1582_s11 = sand.u32 (!%p1529_p8), 1, %s1442_s13  }
  0x29   : > { %s1194_s21 = sshll.u32 (!%p1529_p8), %s1582_s11, 3  ;;  %s183_s22 = scalar_lea.sflag (!%p1529_p8), [#allocation4], %s1582_s11 }
  0x2a   : > { %s186_s24 = scalar_lea.vmem (!%p1529_p8), [#allocation3], %s1194_s21 }
  0x2d   : > { %1425 = dma.done.wait (%p1516_p4), %s183_s22, 128  }
  0x2e   : > { %1427 = vsyncadd (%p1516_p4), %s183_s22, 4294967168 }
  0x2f   : > { %1429 = dma.done.wait (%p41_p1), [#allocation7], 32896  }
  0x30   : > { %1431 = vsyncadd (%p41_p1), [#allocation7], 4294934400  ;;  %v221_v0 = vlaneseq  ;;  %v220_v3 = vld [vmem:[%s186_s24] sm:$0xff]  ;;  %s1456_s18 = smov 113   ;;  %s1457_s23 = smov 1   ;;  %v1464_v24 = vmov 0.0  }
  0x31   : > { %255 = vst [vmem:[#allocation1] ss:$2 sm:$0xff] %v220_v3  ;;  %s1458_s25 = smov 111   ;;  %s1459_s26 = smov 15   ;;  %vm323_vm5 = vcmask 1043576   ;;  %v1465_v26 = vmov 1.0  }
  0x32   : > { %v222_v1 = vand.u32 127, %v221_v0  ;;  %s1460_s27 = smov 127   ;;  %s1461_s28 = smov 112   ;;  %277 = vst [vmem:[#allocation2 + $0x10] sm:$0xff] %v1464_v24  ;;  %vm398_vm4 = vcmp.lt.s32.totalorder %v221_v0, 256  ;;  %vm363_vm6 = vcmask 924672  }
  0x33   : > { %s1462_s29 = smov 17   ;;  %s1463_s30 = smov 16   ;;  %275 = vst [vmem:[#allocation2] sm:$0xff] %v1464_v24  ;;  %vm368_vm7 = vcmask 920576   ;;  %vm378_vm8 = vcmask 916480   ;;  %vm383_vm9 = vcmask 916484  }
  0x34   : > { %v223_v2 = vadd.s32 128, %v222_v1  ;;  %v228_v4 = vand.u32 15, %v222_v1  ;;  %276 = vst [vmem:[#allocation2 + $0x8] sm:$0xff] %v1464_v24  ;;  %vm389_vm10 = vcmask 908288   ;;  %vm332_vm11 = vcmask 7168   ;;  %v403_v56 = vld [vmem:[#allocation6] sm:$0xff] }
  0x35   : > { %278 = vst [vmem:[#allocation2 + $0x18] sm:$0xff] %v1464_v24  ;;  %vm394_vm12 = vcmask 904192   ;;  %vm336_vm13 = vcmask 1047564   ;;  %vm310_vm14 = vcmask 1047684   ;;  %vm319_vm15 = vcmask 121856   ;;  %v615_v61 = vld [vmem:[#allocation8 + $0x3c0] sm:$0xff] }
  0x36   : > { %v235_v5 = vand.u32 15, %v223_v2  ;;  %vm248_vm0 = vcmp.eq.s32.totalorder %v228_v4, 15  ;;  %vm262_vm2 = vcmp.eq.s32.totalorder %v228_v4, 0  ;;  %279 = vst [vmem:[#allocation2 + $0x20] sm:$0xff] %v1464_v24  ;;  %v743_v62 = vld [vmem:[#allocation8 + $0x7c0] sm:$0xff]  ;;  %v616_v63 = vld [vmem:[#allocation8 + $0x3c8] sm:$0xff]  ;;  %751 = vmatpush.msra.mxu2 %v615_v61 }
  0x37   : > { %280 = vst [vmem:[#allocation2 + $0x28] sm:$0xff] %v1464_v24  ;;  %771 = vmatpush.msra.mxu3 %v743_v62  ;;  %v744_v0 = vld [vmem:[#allocation8 + $0x7c8] sm:$0xff]  ;;  %v607_v1 = vld [vmem:[#allocation8 + $0x380] sm:$0xff]  ;;  %s1197_s4 = sshll.u32 %s1582_s11, 6  ;;  %s1208_s7 = sshll.u32 %s1507_s16, 6 }
  0x38   : > { %vm249_vm1 = vcmp.eq.s32.totalorder %v235_v5, 15  ;;  %v256_v6 = vld.sshfl [vmem:[#allocation1] sm:$0xff pattern:$0x75316420]  ;;  %vm263_vm3 = vcmp.eq.s32.totalorder %v235_v5, 0  ;;  %281 = vst [vmem:[#allocation2 + $0x30] sm:$0xff] %v1464_v24  ;;  %752 = vmatpush.msra.mxu2 %v607_v1  ;;  %s1091_s20 = scalar_lea.hbm %s1676_s3, %s1208_s7 }
  0x39   : > { %v257_v7 = vld.sshfl [vmem:[#allocation1 + $0x8] sm:$0xff pattern:$0x75316420]  ;;  %v260_v8 = vsel %vm248_vm0, 0.0, %v256_v6  ;;  %282 = vst [vmem:[#allocation2 + $0x38] sm:$0xff] %v1464_v24  ;;  %vm357_vm0 = vcmask 1039364  }
  0x3a   : > { %268 = vst [vmem:[#allocation1] ss:$2 sm:$0xff] %v220_v3  ;;  %v261_v9 = vsel %vm249_vm1, 0.0, %v257_v7  ;;  %359 = vrot.lane.b32.xlu1 %v260_v8, %s1456_s18  ;;  %v326_v14 = vrot.slane %v260_v8, 4  ;;  %vm418_vm1 = vcmask 1044480   ;;  %v735_v2 = vld [vmem:[#allocation8 + $0x780] sm:$0xff] }
  0x3b   : > { %v327_v10 = vrot.slane %v261_v9, 4  ;;  %283 = vst [vmem:[#allocation2 + $0x40] sm:$0x1f] %v1464_v24  ;;  %v736_v4 = vld [vmem:[#allocation8 + $0x788] sm:$0xff]  ;;  %v599_v5 = vld [vmem:[#allocation8 + $0x340] sm:$0xff]  ;;  %772 = vmatpush.msra.mxu3 %v735_v2  ;;  %s1629_s5 = scalar_lea.vmem [#allocation9], %s1197_s4 }
  0x3c   : > { %284 = vst [vmem:[#allocation2 + $0x48] sm:$0x1f] %v1464_v24  ;;  %v727_v6 = vld [vmem:[#allocation8 + $0x740] sm:$0xff]  ;;  %v600_v7 = vld [vmem:[#allocation8 + $0x348] sm:$0xff]  ;;  %753 = vmatpush.msra.mxu2 %v599_v5  ;;  %v618_v5 = vld [vmem:[#allocation8 + $0x3d8] sm:$0xff]  ;;  %s1093_s21 = sshll.u32 %s1629_s5, 4  ;;  %s1094_s21 = int_to_ptr.vmem [resolvable:$true] %s1093_s21 }
  0x3d   : > { %330 = vrot.lane.b32.xlu2 %v327_v10, %s1457_s23  ;;  %401 = vst.msk [vmem:[#allocation2 + $0x44] ss:$8 sm:$0x3] %vm398_vm4, %v1465_v26  ;;  %vm291_vm4 = vcmask 138240   ;;  %v719_v10 = vld [vmem:[#allocation8 + $0x700] sm:$0xff]  ;;  %773 = vmatpush.msra.mxu3 %v727_v6  ;;  %v696_v24 = vld [vmem:[#allocation8 + $0x648] sm:$0xff] }
  0x3e   : > { %v687_v26 = vld [vmem:[#allocation8 + $0x600] sm:$0xff]  ;;  %v632_v61 = vld [vmem:[#allocation8 + $0x448] sm:$0xff]  ;;  %v746_v6 = vld [vmem:[#allocation8 + $0x7d8] sm:$0xff]  ;;  %s1095_s22 = sshll.u32 %s1091_s20, 4  ;;  %s1080_s24 = scalar_lea.sflag [#allocation5], %s1582_s11  ;;  %s1096_s22 = int_to_ptr.hbm [resolvable:$true] %s1095_s22 }
  0x3f   : > { %774 = vmatpush.msra.mxu3 %v719_v10  ;;  %v496_v1 = vld [vmem:[#allocation8 + $0x8] sm:$0xff]  ;;  %v738_v10 = vld [vmem:[#allocation8 + $0x798] sm:$0xff] }
  0x40   : > { %v624_v2 = vld [vmem:[#allocation8 + $0x408] sm:$0xff] }
  0x41   : > { %v269_v11 = vld.sshfl [vmem:[#allocation1] sm:$0xff pattern:$0x75316420]  ;;  %v270_v12 = vld.sshfl [vmem:[#allocation1 + $0x8] sm:$0xff pattern:$0x75316420] }
  0x42   : > { %v273_v13 = vsel %vm262_vm2, 0.0, %v269_v11  ;;  %299 = vst [vmem:[#allocation1 + $0x1] ss:$2 sm:$0xff] %v220_v3  ;;  %361 = vrot.lane.b32.xlu1 %v261_v9, %s1456_s18  ;;  %v274_v15 = vsel %vm263_vm3, 0.0, %v270_v12  ;;  %vm352_vm2 = vcmask 1039360   ;;  %vm295_vm3 = vcmask 1043592  }
  0x43   : > { %385 = vrot.lane.b32.xlu0 %v273_v13, %s1458_s25  ;;  %v347_v18 = vrot.slane %v274_v15, 4  ;;  %v346_v21 = vrot.slane %v273_v13, 4  ;;  %v592_v11 = vld [vmem:[#allocation8 + $0x308] sm:$0xff]  ;;  %s1394_s18 = sshra.s32 %s1096_s22, 4  ;;  %s1395_s18 = int_to_ptr.hbm [resolvable:$true] %s1394_s18 }
  0x44   : > { %v720_v12 = vld [vmem:[#allocation8 + $0x708] sm:$0xff]  ;;  %s1396_s16 = scalar_lea.hbm %s1395_s18, 64  ;;  %p1401_p9 = scmp.lt.s32.totalorder %s1395_s18, %s1676_s3 }
  0x45   : > { %315 = vrot.lane.b32.xlu2 %v273_v13, %s1459_s26  ;;  %v583_v13 = vld [vmem:[#allocation8 + $0x2c0] sm:$0xff]  ;;  %p1397_p1 = scmp.ne.s32.totalorder %s1395_s18, %s1396_s16 }
  0x47   : > { %p1398_p4 = pnand %p1397_p1, %p1555_p5 }
  0x49   : > { %v300_v16 = vld.sshfl [vmem:[#allocation1] sm:$0xff pattern:$0x75316420]  ;;  %v301_v17 = vld.sshfl [vmem:[#allocation1 + $0x8] sm:$0xff pattern:$0x75316420]  ;;  %p1399_p8 = pneg %p1398_p4 }
  0x4a   : > { %339 = vst [vmem:[#allocation1] ss:$2 sm:$0xff] %v220_v3  ;;  %328 = vrot.lane.b32.xlu1 %v326_v14, %s1457_s23  ;;  %v711_v14 = vld [vmem:[#allocation8 + $0x6c0] sm:$0xff] }
  0x4b   : > { %387 = vrot.lane.b32.xlu0 %v274_v15, %s1458_s25  ;;  %775 = vmatpush.msra.mxu3 %v711_v14  ;;  %v730_v14 = vld [vmem:[#allocation8 + $0x758] sm:$0xff] }
  0x51   : > { %v340_v19 = vld.sshfl [vmem:[#allocation1] sm:$0xff pattern:$0x75316420]  ;;  %v341_v20 = vld.sshfl [vmem:[#allocation1 + $0x8] sm:$0xff pattern:$0x75316420] }
  0x52   : > { %371 = vst [vmem:[#allocation1 + $0x1] ss:$2 sm:$0xff] %v220_v3  ;;  %350 = vrot.lane.b32.xlu1 %v347_v18, %s1460_s27  ;;  %v608_v3 = vld [vmem:[#allocation8 + $0x388] sm:$0xff]  ;;  %v703_v18 = vld [vmem:[#allocation8 + $0x680] sm:$0xff] }
  0x53   : > { %317 = vrot.lane.b32.xlu0 %v274_v15, %s1459_s26  ;;  %344 = vst [vmem:[#allocation2 + $0x20] sm:$0xf] %v340_v19  ;;  %v584_v15 = vld [vmem:[#allocation8 + $0x2c8] sm:$0xff]  ;;  %776 = vmatpush.msra.mxu3 %v703_v18  ;;  %v722_v18 = vld [vmem:[#allocation8 + $0x718] sm:$0xff]  ;;  %s1400_s26 = scalar_lea.hbm %s1676_s3, 128 }
  0x54   : > { %345 = vst [vmem:[#allocation2 + $0x28] sm:$0xf] %v341_v20  ;;  %v576_v19 = vld [vmem:[#allocation8 + $0x288] sm:$0xff]  ;;  %p1402_p10 = scmp.lt.s32.totalorder %s1400_s26, %s1396_s16 }
  0x55   : > { %v704_v20 = vld [vmem:[#allocation8 + $0x688] sm:$0xff] }
  0x56   : > { %p1403_p2 = por %p1402_p10, %p1401_p9 }
  0x58   : > { %p1404_p11 = pnand %p1403_p2, %p1399_p8 }
  0x59   : > { %v372_v22 = vld.sshfl [vmem:[#allocation1] sm:$0xff pattern:$0x75316420]  ;;  %v373_v23 = vld.sshfl [vmem:[#allocation1 + $0x8] sm:$0xff pattern:$0x75316420] }
  0x5a   : > { %374 = vrot.lane.b32.xlu2 %v372_v22, %s1461_s28  ;;  %289 = vrot.lane.b32.xlu1 %v261_v9, %s1462_s29  ;;  %v591_v9 = vld [vmem:[#allocation8 + $0x300] sm:$0xff] }
  0x5b   : > { %348 = vrot.lane.b32.xlu0 %v346_v21, %s1460_s27  ;;  %754 = vmatpush.msra.mxu2 %v591_v9  ;;  %v567_v21 = vld [vmem:[#allocation8 + $0x240] sm:$0xff]  ;;  %v610_v9 = vld [vmem:[#allocation8 + $0x398] sm:$0xff] }
  0x5c   : > { %v695_v22 = vld [vmem:[#allocation8 + $0x640] sm:$0xff] }
  0x5d   : > { %755 = vmatpush.msra.mxu2 %v583_v13  ;;  %777 = vmatpush.msra.mxu3 %v695_v22  ;;  %v602_v13 = vld [vmem:[#allocation8 + $0x358] sm:$0xff] }
  0x5e   : > { %v714_v22 = vld [vmem:[#allocation8 + $0x6d8] sm:$0xff] }
  0x5f   : > { %778 = vmatpush.msra.mxu3 %v687_v26  ;;  %v706_v26 = vld [vmem:[#allocation8 + $0x698] sm:$0xff] }
  0x62   : > { %376 = vrot.lane.b32.xlu2 %v373_v23, %s1461_s28  ;;  %v568_v23 = vld [vmem:[#allocation8 + $0x248] sm:$0xff] }
  0x63   : > { %287 = vrot.lane.b32.xlu0 %v260_v8, %s1462_s29  ;;  %v728_v8 = vld [vmem:[#allocation8 + $0x748] sm:$0xff] }
  0x6a   : > { %302 = vrot.lane.b32.xlu2 %v300_v16, %s1463_s30  ;;  %v712_v16 = vld [vmem:[#allocation8 + $0x6c8] sm:$0xff] }
  0x6b   : > { %304 = vrot.lane.b32.xlu0 %v301_v17, %s1463_s30  ;;  %v575_v17 = vld [vmem:[#allocation8 + $0x280] sm:$0xff] }
  0x6c   : > { %756 = vmatpush.msra.mxu2 %v575_v17  ;;  %v594_v17 = vld [vmem:[#allocation8 + $0x318] sm:$0xff] }
  0x6e   : > { %757 = vmatpush.msra.mxu2 %v567_v21  ;;  %v586_v21 = vld [vmem:[#allocation8 + $0x2d8] sm:$0xff] }
  0x97   : > { %v331_v25 = vpop.permute.xlu2 %330 }
  0x9f   : > { %v316_v27 = vpop.permute.xlu2 %315 }
  0xa0   : > { %324 = vst.msk [vmem:[#allocation2 + $0x10] sm:$0xf] %vm323_vm5, %v316_v27  ;;  %vm306_vm5 = vcmask 130048  }
  0xac   : > { %v360_v28 = vpop.permute.xlu1 %359 }
  0xb4   : > { %v375_v29 = vpop.permute.xlu2 %374  ;;  %v362_v31 = vpop.permute.xlu1 %361 }
  0xb5   : > { %v386_v30 = vpop.permute.xlu0 %385  ;;  %v364_v32 = vsel %vm363_vm6, %v360_v28, %v362_v31  ;;  %369 = vst.msk [vmem:[#allocation2 + $0x38] sm:$0xf] %vm368_vm7, %v362_v31  ;;  %vm414_vm6 = vcmask 302080   ;;  %v688_v28 = vld [vmem:[#allocation8 + $0x608] sm:$0xff] }
  0xb6   : > { %367 = vst [vmem:[#allocation2 + $0x30] sm:$0xf] %v364_v32  ;;  %v552_v31 = vld [vmem:[#allocation8 + $0x1c8] sm:$0xff] }
  0xb7   : > { %v680_v32 = vld [vmem:[#allocation8 + $0x5c8] sm:$0xff] }
  0xbc   : > { %v377_v33 = vpop.permute.xlu2 %376  ;;  %v329_v36 = vpop.permute.xlu1 %328 }
  0xbd   : > { %v379_v34 = vsel %vm378_vm8, %v375_v29, %v377_v33  ;;  %384 = vst.msk [vmem:[#allocation2 + $0x38] sm:$0xf0] %vm383_vm9, %v377_v33  ;;  %v388_v35 = vpop.permute.xlu0 %387  ;;  %v333_v38 = vsel %vm332_vm11, %v329_v36, %v331_v25  ;;  %v559_v25 = vld [vmem:[#allocation8 + $0x200] sm:$0xff] }
  0xbe   : > { %382 = vst [vmem:[#allocation2 + $0x30] sm:$0xf0] %v379_v34  ;;  %v390_v37 = vsel %vm389_vm10, %v386_v30, %v388_v35  ;;  %v551_v29 = vld [vmem:[#allocation8 + $0x1c0] sm:$0xff]  ;;  %758 = vmatpush.msra.mxu2 %v559_v25  ;;  %v578_v25 = vld [vmem:[#allocation8 + $0x298] sm:$0xff] }
  0xbf   : > { %393 = vst [vmem:[#allocation2 + $0x40] sm:$0xf] %v390_v37  ;;  %v679_v30 = vld [vmem:[#allocation8 + $0x5c0] sm:$0xff] }
  0xc0   : > { %395 = vst.msk [vmem:[#allocation2 + $0x48] sm:$0xf] %vm394_vm12, %v388_v35  ;;  %v543_v33 = vld [vmem:[#allocation8 + $0x180] sm:$0xff]  ;;  %759 = vmatpush.msra.mxu2 %v551_v29  ;;  %779 = vmatpush.msra.mxu3 %v679_v30  ;;  %v544_v35 = vld [vmem:[#allocation8 + $0x188] sm:$0xff]  ;;  %v570_v29 = vld [vmem:[#allocation8 + $0x258] sm:$0xff] }
  0xc1   : > { %337 = vst.msk [vmem:[#allocation2 + $0x10] sm:$0xf0] %vm336_vm13, %v329_v36  ;;  %v671_v34 = vld [vmem:[#allocation8 + $0x580] sm:$0xff]  ;;  %v672_v36 = vld [vmem:[#allocation8 + $0x588] sm:$0xff]  ;;  %v698_v30 = vld [vmem:[#allocation8 + $0x658] sm:$0xff] }
  0xc2   : > { %338 = vst [vmem:[#allocation2 + $0x18] sm:$0xf0] %v333_v38  ;;  %v535_v37 = vld [vmem:[#allocation8 + $0x140] sm:$0xff]  ;;  %760 = vmatpush.msra.mxu2 %v543_v33  ;;  %780 = vmatpush.msra.mxu3 %v671_v34  ;;  %v562_v33 = vld [vmem:[#allocation8 + $0x218] sm:$0xff] }
  0xc3   : > { %v663_v38 = vld [vmem:[#allocation8 + $0x540] sm:$0xff]  ;;  %v690_v34 = vld [vmem:[#allocation8 + $0x618] sm:$0xff] }
  0xc4   : > { %v303_v39 = vpop.permute.xlu2 %302  ;;  %v351_v41 = vpop.permute.xlu1 %350  ;;  %v411_v45 = vld [vmem:[#allocation2 + $0x38] sm:$0xff]  ;;  %761 = vmatpush.msra.mxu2 %v535_v37  ;;  %781 = vmatpush.msra.mxu3 %v663_v38  ;;  %v554_v37 = vld [vmem:[#allocation8 + $0x1d8] sm:$0xff] }
  0xc5   : > { %v318_v40 = vpop.permute.xlu0 %317  ;;  %311 = vst.msk [vmem:[#allocation2] sm:$0xf0] %vm310_vm14, %v303_v39  ;;  %v410_v46 = vld [vmem:[#allocation2 + $0x30] sm:$0xff]  ;;  %v682_v38 = vld [vmem:[#allocation8 + $0x5d8] sm:$0xff] }
  0xc6   : > { %v320_v42 = vsel %vm319_vm15, %v316_v27, %v318_v40  ;;  %358 = vst.msk [vmem:[#allocation2 + $0x28] sm:$0xf0] %vm357_vm0, %v351_v41  ;;  %v412_v43 = vld [vmem:[#allocation2 + $0x40] sm:$0x1f]  ;;  %v560_v27 = vld [vmem:[#allocation8 + $0x208] sm:$0xff] }
  0xc7   : > { %325 = vst [vmem:[#allocation2 + $0x18] sm:$0xf] %v320_v42  ;;  %v413_v44 = vld [vmem:[#allocation2 + $0x48] sm:$0x1f]  ;;  %1198 = vmatpush.msk.msra.mxu0 %vm418_vm1, %v412_v43  ;;  %v664_v40 = vld [vmem:[#allocation8 + $0x548] sm:$0xff] }
  0xc8   : > { %1200 = vmatpush.msk.msra.mxu1 %vm418_vm1, %v413_v44  ;;  %v406_v55 = vld [vmem:[#allocation2 + $0x10] sm:$0xff]  ;;  %v655_v42 = vld [vmem:[#allocation8 + $0x500] sm:$0xff] }
  0xc9   : > { %437 = vmatpush.msra.mxu0 %v410_v46  ;;  %v528_v43 = vld [vmem:[#allocation8 + $0x108] sm:$0xff]  ;;  %v647_v46 = vld [vmem:[#allocation8 + $0x4c0] sm:$0xff]  ;;  %782 = vmatpush.msra.mxu3 %v655_v42  ;;  %v674_v42 = vld [vmem:[#allocation8 + $0x598] sm:$0xff] }
  0xca   : > { %457 = vmatpush.msra.mxu1 %v411_v45  ;;  %v656_v44 = vld [vmem:[#allocation8 + $0x508] sm:$0xff]  ;;  %v519_v45 = vld [vmem:[#allocation8 + $0xc0] sm:$0xff] }
  0xcb   : > { %783 = vmatpush.msra.mxu3 %v647_v46  ;;  %v666_v46 = vld [vmem:[#allocation8 + $0x558] sm:$0xff] }
  0xcc   : > { %v290_v51 = vpop.permute.xlu1 %289 }
  0xcd   : > { %v349_v47 = vpop.permute.xlu0 %348  ;;  %v409_v48 = vld [vmem:[#allocation2 + $0x28] sm:$0xff] }
  0xce   : > { %v353_v49 = vsel %vm352_vm2, %v349_v47, %v351_v41  ;;  %458 = vmatpush.msra.mxu1 %v409_v48  ;;  %v407_v50 = vld [vmem:[#allocation2 + $0x18] sm:$0xff]  ;;  %v527_v41 = vld [vmem:[#allocation8 + $0x100] sm:$0xff]  ;;  %v520_v48 = vld [vmem:[#allocation8 + $0xc8] sm:$0xff] }
  0xcf   : > { %356 = vst [vmem:[#allocation2 + $0x20] sm:$0xf0] %v353_v49  ;;  %762 = vmatpush.msra.mxu2 %v527_v41  ;;  %v648_v49 = vld [vmem:[#allocation8 + $0x4c8] sm:$0xff]  ;;  %v546_v41 = vld [vmem:[#allocation8 + $0x198] sm:$0xff] }
  0xd0   : > { %459 = vmatpush.msra.mxu1 %v407_v50  ;;  %v511_v50 = vld [vmem:[#allocation8 + $0x80] sm:$0xff] }
  0xd1   : > { %763 = vmatpush.msra.mxu2 %v519_v45  ;;  %v538_v45 = vld [vmem:[#allocation8 + $0x158] sm:$0xff] }
  0xd3   : > { %764 = vmatpush.msra.mxu2 %v511_v50  ;;  %v530_v50 = vld [vmem:[#allocation8 + $0x118] sm:$0xff] }
  0xd5   : > { %v288_v52 = vpop.permute.xlu0 %287 }
  0xd6   : > { %296 = vst.msk [vmem:[#allocation2] sm:$0xf] %vm295_vm3, %v288_v52  ;;  %v292_v53 = vsel %vm291_vm4, %v288_v52, %v290_v51  ;;  %v408_v54 = vld [vmem:[#allocation2 + $0x20] sm:$0xff]  ;;  %v639_v51 = vld [vmem:[#allocation8 + $0x480] sm:$0xff]  ;;  %v512_v52 = vld [vmem:[#allocation8 + $0x88] sm:$0xff] }
  0xd7   : > { %297 = vst [vmem:[#allocation2 + $0x8] sm:$0xf] %v292_v53  ;;  %438 = vmatpush.msra.mxu0 %v408_v54  ;;  %v640_v53 = vld [vmem:[#allocation8 + $0x488] sm:$0xff]  ;;  %784 = vmatpush.msra.mxu3 %v639_v51  ;;  %v658_v51 = vld [vmem:[#allocation8 + $0x518] sm:$0xff] }
  0xd9   : > { %439 = vmatpush.msra.mxu0 %v406_v55  ;;  %v503_v55 = vld [vmem:[#allocation8 + $0x40] sm:$0xff] }
  0xda   : > { %765 = vmatpush.msra.mxu2 %v503_v55  ;;  %v650_v55 = vld [vmem:[#allocation8 + $0x4d8] sm:$0xff] }
  0xdd   : > { %v305_v57 = vpop.permute.xlu0 %304  ;;  %v404_v58 = vld [vmem:[#allocation2] sm:$0xff] }
  0xde   : > { %v307_v59 = vsel %vm306_vm5, %v303_v39, %v305_v57  ;;  %440 = vmatpush.msra.mxu0 %v404_v58  ;;  %v536_v39 = vld [vmem:[#allocation8 + $0x148] sm:$0xff] }
  0xdf   : > { %312 = vst [vmem:[#allocation2 + $0x8] sm:$0xf0] %v307_v59  ;;  %1199 = vmatmul.msk.f32.vlgmr.msra.gmra.mxu0 %vm414_vm6, %v403_v56  ;;  %v504_v58 = vld [vmem:[#allocation8 + $0x48] sm:$0xff] }
  0xe0   : > { %791 = vmatpush.msrb.mxu0 %v616_v63  ;;  %v495_v63 = vld [vmem:[#allocation8] sm:$0xff] }
  0xe1   : > { %766 = vmatpush.msra.mxu2 %v495_v63 }
  0xe2   : > { %792 = vmatpush.msrb.mxu0 %v608_v3  ;;  %v617_v3 = vld [vmem:[#allocation8 + $0x3d0] sm:$0xff] }
  0xe3   : > { %831 = vmatpush.msrb.mxu2 %v617_v3  ;;  %v497_v3 = vld [vmem:[#allocation8 + $0x10] sm:$0xff] }
  0xe4   : > { %793 = vmatpush.msrb.mxu0 %v600_v7  ;;  %v609_v7 = vld [vmem:[#allocation8 + $0x390] sm:$0xff] }
  0xe5   : > { %832 = vmatpush.msrb.mxu2 %v609_v7  ;;  %v626_v7 = vld [vmem:[#allocation8 + $0x418] sm:$0xff] }
  0xe6   : > { %v405_v60 = vld [vmem:[#allocation2 + $0x8] sm:$0xff]  ;;  %794 = vmatpush.msrb.mxu0 %v592_v11  ;;  %v601_v11 = vld [vmem:[#allocation8 + $0x350] sm:$0xff] }
  0xe7   : > { %460 = vmatpush.msra.mxu1 %v405_v60  ;;  %833 = vmatpush.msrb.mxu2 %v601_v11 }
  0xe8   : > { %1201 = vmatmul.msk.f32.vlgmr.msra.gmra.mxu1 %vm414_vm6, %v403_v56  ;;  %795 = vmatpush.msrb.mxu0 %v584_v15  ;;  %v631_v56 = vld [vmem:[#allocation8 + $0x440] sm:$0xff]  ;;  %v593_v15 = vld [vmem:[#allocation8 + $0x310] sm:$0xff] }
  0xe9   : > { %811 = vmatpush.msrb.mxu1 %v744_v0  ;;  %785 = vmatpush.msra.mxu3 %v631_v56  ;;  %v623_v0 = vld [vmem:[#allocation8 + $0x400] sm:$0xff]  ;;  %v513_v56 = vld [vmem:[#allocation8 + $0x90] sm:$0xff] }
  0xea   : > { %796 = vmatpush.msrb.mxu0 %v576_v19  ;;  %834 = vmatpush.msrb.mxu2 %v593_v15  ;;  %v585_v19 = vld [vmem:[#allocation8 + $0x2d0] sm:$0xff] }
  0xeb   : > { %812 = vmatpush.msrb.mxu1 %v736_v4  ;;  %786 = vmatpush.msra.mxu3 %v623_v0  ;;  %v745_v4 = vld [vmem:[#allocation8 + $0x7d0] sm:$0xff]  ;;  %v506_v0 = vld [vmem:[#allocation8 + $0x58] sm:$0xff] }
  0xec   : > { %797 = vmatpush.msrb.mxu0 %v568_v23  ;;  %835 = vmatpush.msrb.mxu2 %v585_v19  ;;  %v577_v23 = vld [vmem:[#allocation8 + $0x290] sm:$0xff] }
  0xed   : > { %813 = vmatpush.msrb.mxu1 %v728_v8  ;;  %851 = vmatpush.msrb.mxu3 %v745_v4  ;;  %v737_v8 = vld [vmem:[#allocation8 + $0x790] sm:$0xff] }
  0xee   : > { %798 = vmatpush.msrb.mxu0 %v560_v27  ;;  %836 = vmatpush.msrb.mxu2 %v577_v23  ;;  %v569_v27 = vld [vmem:[#allocation8 + $0x250] sm:$0xff] }
  0xef   : > { %814 = vmatpush.msrb.mxu1 %v720_v12  ;;  %852 = vmatpush.msrb.mxu3 %v737_v8  ;;  %v729_v12 = vld [vmem:[#allocation8 + $0x750] sm:$0xff] }
  0xf0   : > { %799 = vmatpush.msrb.mxu0 %v552_v31  ;;  %837 = vmatpush.msrb.mxu2 %v569_v27  ;;  %v561_v31 = vld [vmem:[#allocation8 + $0x210] sm:$0xff]  ;;  %v747_v27 = vld [vmem:[#allocation8 + $0x7e0] sm:$0xff] }
  0xf1   : > { %815 = vmatpush.msrb.mxu1 %v712_v16  ;;  %853 = vmatpush.msrb.mxu3 %v729_v12  ;;  %v721_v16 = vld [vmem:[#allocation8 + $0x710] sm:$0xff] }
  0xf2   : > { %800 = vmatpush.msrb.mxu0 %v544_v35  ;;  %838 = vmatpush.msrb.mxu2 %v561_v31  ;;  %v553_v35 = vld [vmem:[#allocation8 + $0x1d0] sm:$0xff]  ;;  %v740_v31 = vld [vmem:[#allocation8 + $0x7a8] sm:$0xff] }
  0xf3   : > { %816 = vmatpush.msrb.mxu1 %v704_v20  ;;  %854 = vmatpush.msrb.mxu3 %v721_v16  ;;  %v713_v20 = vld [vmem:[#allocation8 + $0x6d0] sm:$0xff] }
  0xf4   : > { %801 = vmatpush.msrb.mxu0 %v536_v39  ;;  %839 = vmatpush.msrb.mxu2 %v553_v35  ;;  %v545_v39 = vld [vmem:[#allocation8 + $0x190] sm:$0xff]  ;;  %v732_v35 = vld [vmem:[#allocation8 + $0x768] sm:$0xff] }
  0xf5   : > { %817 = vmatpush.msrb.mxu1 %v696_v24  ;;  %855 = vmatpush.msrb.mxu3 %v713_v20  ;;  %v705_v24 = vld [vmem:[#allocation8 + $0x690] sm:$0xff] }
  0xf6   : > { %802 = vmatpush.msrb.mxu0 %v528_v43  ;;  %840 = vmatpush.msrb.mxu2 %v545_v39  ;;  %v537_v43 = vld [vmem:[#allocation8 + $0x150] sm:$0xff]  ;;  %v724_v39 = vld [vmem:[#allocation8 + $0x728] sm:$0xff] }
  0xf7   : > { %818 = vmatpush.msrb.mxu1 %v688_v28  ;;  %856 = vmatpush.msrb.mxu3 %v705_v24  ;;  %v697_v28 = vld [vmem:[#allocation8 + $0x650] sm:$0xff] }
  0xf8   : > { %803 = vmatpush.msrb.mxu0 %v520_v48  ;;  %841 = vmatpush.msrb.mxu2 %v537_v43  ;;  %v529_v48 = vld [vmem:[#allocation8 + $0x110] sm:$0xff]  ;;  %v716_v43 = vld [vmem:[#allocation8 + $0x6e8] sm:$0xff] }
  0xf9   : > { %819 = vmatpush.msrb.mxu1 %v680_v32  ;;  %857 = vmatpush.msrb.mxu3 %v697_v28  ;;  %v689_v32 = vld [vmem:[#allocation8 + $0x610] sm:$0xff]  ;;  %v620_v28 = vld [vmem:[#allocation8 + $0x3e8] sm:$0xff] }
  0xfa   : > { %804 = vmatpush.msrb.mxu0 %v512_v52  ;;  %842 = vmatpush.msrb.mxu2 %v529_v48  ;;  %v521_v52 = vld [vmem:[#allocation8 + $0xd0] sm:$0xff]  ;;  %v708_v48 = vld [vmem:[#allocation8 + $0x6a8] sm:$0xff] }
  0xfb   : > { %820 = vmatpush.msrb.mxu1 %v672_v36  ;;  %858 = vmatpush.msrb.mxu3 %v689_v32  ;;  %v681_v36 = vld [vmem:[#allocation8 + $0x5d0] sm:$0xff]  ;;  %v603_v32 = vld [vmem:[#allocation8 + $0x360] sm:$0xff] }
  0xfc   : > { %805 = vmatpush.msrb.mxu0 %v504_v58  ;;  %843 = vmatpush.msrb.mxu2 %v521_v52  ;;  %v641_v58 = vld [vmem:[#allocation8 + $0x490] sm:$0xff]  ;;  %v700_v52 = vld [vmem:[#allocation8 + $0x668] sm:$0xff] }
  0xfd   : > { %821 = vmatpush.msrb.mxu1 %v664_v40  ;;  %859 = vmatpush.msrb.mxu3 %v681_v36  ;;  %v673_v40 = vld [vmem:[#allocation8 + $0x590] sm:$0xff]  ;;  %v595_v36 = vld [vmem:[#allocation8 + $0x320] sm:$0xff] }
  0xfe   : > { %806 = vmatpush.msrb.mxu0 %v496_v1  ;;  %844 = vmatpush.msrb.mxu2 %v513_v56  ;;  %v634_v1 = vld [vmem:[#allocation8 + $0x458] sm:$0xff]  ;;  %v625_v4 = vld [vmem:[#allocation8 + $0x410] sm:$0xff]  ;;  %v692_v56 = vld [vmem:[#allocation8 + $0x628] sm:$0xff] }
  0xff   : > { %822 = vmatpush.msrb.mxu1 %v656_v44  ;;  %860 = vmatpush.msrb.mxu3 %v673_v40  ;;  %v665_v44 = vld [vmem:[#allocation8 + $0x550] sm:$0xff]  ;;  %v587_v40 = vld [vmem:[#allocation8 + $0x2e0] sm:$0xff] }
 0x100   : > { %871 = vmatpush.msra.mxu0 %v618_v5 }
 0x101   : > { %823 = vmatpush.msrb.mxu1 %v648_v49  ;;  %861 = vmatpush.msrb.mxu3 %v665_v44  ;;  %v657_v49 = vld [vmem:[#allocation8 + $0x510] sm:$0xff]  ;;  %v579_v44 = vld [vmem:[#allocation8 + $0x2a0] sm:$0xff] }
 0x102   : > { %872 = vmatpush.msra.mxu0 %v610_v9 }
 0x103   : > { %824 = vmatpush.msrb.mxu1 %v640_v53  ;;  %862 = vmatpush.msrb.mxu3 %v657_v49  ;;  %v649_v53 = vld [vmem:[#allocation8 + $0x4d0] sm:$0xff]  ;;  %v571_v49 = vld [vmem:[#allocation8 + $0x260] sm:$0xff] }
 0x104   : > { %873 = vmatpush.msra.mxu0 %v602_v13 }
 0x105   : > { %825 = vmatpush.msrb.mxu1 %v632_v61  ;;  %863 = vmatpush.msrb.mxu3 %v649_v53  ;;  %v505_v61 = vld [vmem:[#allocation8 + $0x50] sm:$0xff]  ;;  %v563_v53 = vld [vmem:[#allocation8 + $0x220] sm:$0xff] }
 0x106   : > { %874 = vmatpush.msra.mxu0 %v594_v17  ;;  %845 = vmatpush.msrb.mxu2 %v505_v61  ;;  %v684_v61 = vld [vmem:[#allocation8 + $0x5e8] sm:$0xff] }
 0x107   : > { %826 = vmatpush.msrb.mxu1 %v624_v2  ;;  %864 = vmatpush.msrb.mxu3 %v641_v58  ;;  %v555_v58 = vld [vmem:[#allocation8 + $0x1e0] sm:$0xff] }
 0x108   : > { %875 = vmatpush.msra.mxu0 %v586_v21  ;;  %846 = vmatpush.msrb.mxu2 %v497_v3  ;;  %v667_v3 = vld [vmem:[#allocation8 + $0x560] sm:$0xff] }
 0x109   : > { %891 = vmatpush.msra.mxu1 %v746_v6  ;;  %v498_v6 = vld [vmem:[#allocation8 + $0x18] sm:$0xff] }
 0x10a   : > { %876 = vmatpush.msra.mxu0 %v578_v25 }
 0x10b   : > { %892 = vmatpush.msra.mxu1 %v738_v10 }
 0x10c   : > { %877 = vmatpush.msra.mxu0 %v570_v29  ;;  %v748_v29 = vld [vmem:[#allocation8 + $0x7e8] sm:$0xff] }
 0x10d   : > { %893 = vmatpush.msra.mxu1 %v730_v14 }
 0x10e   : > { %878 = vmatpush.msra.mxu0 %v562_v33  ;;  %v731_v33 = vld [vmem:[#allocation8 + $0x760] sm:$0xff] }
 0x10f   : > { %894 = vmatpush.msra.mxu1 %v722_v18 }
 0x110   : > { %879 = vmatpush.msra.mxu0 %v554_v37  ;;  %v723_v37 = vld [vmem:[#allocation8 + $0x720] sm:$0xff] }
 0x111   : > { %895 = vmatpush.msra.mxu1 %v714_v22 }
 0x112   : > { %880 = vmatpush.msra.mxu0 %v546_v41  ;;  %v715_v41 = vld [vmem:[#allocation8 + $0x6e0] sm:$0xff] }
 0x113   : > { %896 = vmatpush.msra.mxu1 %v706_v26  ;;  %v619_v26 = vld [vmem:[#allocation8 + $0x3e0] sm:$0xff] }
 0x114   : > { %881 = vmatpush.msra.mxu0 %v538_v45  ;;  %v707_v45 = vld [vmem:[#allocation8 + $0x6a0] sm:$0xff] }
 0x115   : > { %897 = vmatpush.msra.mxu1 %v698_v30  ;;  %v612_v30 = vld [vmem:[#allocation8 + $0x3a8] sm:$0xff] }
 0x116   : > { %882 = vmatpush.msra.mxu0 %v530_v50  ;;  %v699_v50 = vld [vmem:[#allocation8 + $0x660] sm:$0xff] }
 0x117   : > { %898 = vmatpush.msra.mxu1 %v690_v34  ;;  %v604_v34 = vld [vmem:[#allocation8 + $0x368] sm:$0xff] }
 0x119   : > { %899 = vmatpush.msra.mxu1 %v682_v38  ;;  %v596_v38 = vld [vmem:[#allocation8 + $0x328] sm:$0xff] }
 0x11b   : > { %900 = vmatpush.msra.mxu1 %v674_v42  ;;  %v588_v42 = vld [vmem:[#allocation8 + $0x2e8] sm:$0xff] }
 0x11d   : > { %901 = vmatpush.msra.mxu1 %v666_v46  ;;  %v580_v46 = vld [vmem:[#allocation8 + $0x2a8] sm:$0xff] }
 0x11f   : > { %902 = vmatpush.msra.mxu1 %v658_v51  ;;  %v572_v51 = vld [vmem:[#allocation8 + $0x268] sm:$0xff] }
 0x121   : > { %903 = vmatpush.msra.mxu1 %v650_v55  ;;  %v564_v55 = vld [vmem:[#allocation8 + $0x228] sm:$0xff] }
 0x15c   : > { %v1596_v47 = vpop.f32.mrf.mxu0 }
 0x15d   : > { %v468_v54 = vmul.f32 %v1596_v47, %v1596_v47 }
 0x165   : > { %v1600_v57 = vpop.f32.mrf.mxu1 }
 0x166   : > { %v465_v59 = vadd.f32 %v1600_v57, %v1596_v47  ;;  %v469_v60 = vmul.f32 %v1600_v57, %v1600_v57 }
 0x168   : > { %466 = vadd.xlane.f32.xlu1 %v465_v59  ;;  %v470_v62 = vadd.f32 %v469_v60, %v468_v54  ;;  %v522_v54 = vld [vmem:[#allocation8 + $0xd8] sm:$0xff] }
 0x169   : > { %v514_v59 = vld [vmem:[#allocation8 + $0x98] sm:$0xff]  ;;  %883 = vmatpush.msra.mxu0 %v522_v54  ;;  %v691_v54 = vld [vmem:[#allocation8 + $0x620] sm:$0xff] }
 0x16a   : > { %471 = vadd.xlane.f32.xlu2 %v470_v62  ;;  %v642_v60 = vld [vmem:[#allocation8 + $0x498] sm:$0xff]  ;;  %v633_v62 = vld [vmem:[#allocation8 + $0x450] sm:$0xff] }
 0x16b   : > { %884 = vmatpush.msra.mxu0 %v514_v59  ;;  %904 = vmatpush.msra.mxu1 %v642_v60  ;;  %v683_v59 = vld [vmem:[#allocation8 + $0x5e0] sm:$0xff]  ;;  %v556_v60 = vld [vmem:[#allocation8 + $0x1e8] sm:$0xff] }
 0x16c   : > { %865 = vmatpush.msrb.mxu3 %v633_v62  ;;  %v547_v62 = vld [vmem:[#allocation8 + $0x1a0] sm:$0xff] }
 0x16d   : > { %885 = vmatpush.msra.mxu0 %v506_v0  ;;  %905 = vmatpush.msra.mxu1 %v634_v1  ;;  %v548_v0 = vld [vmem:[#allocation8 + $0x1a8] sm:$0xff] }
 0x16e   : > { %866 = vmatpush.msrb.mxu3 %v625_v4  ;;  %v676_v1 = vld [vmem:[#allocation8 + $0x5a8] sm:$0xff] }
 0x16f   : > { %886 = vmatpush.msra.mxu0 %v498_v6  ;;  %906 = vmatpush.msra.mxu1 %v626_v7  ;;  %v540_v4 = vld [vmem:[#allocation8 + $0x168] sm:$0xff]  ;;  %v531_v6 = vld [vmem:[#allocation8 + $0x120] sm:$0xff] }
 0x170   : > { %v659_v7 = vld [vmem:[#allocation8 + $0x520] sm:$0xff] }
 0x1db   : > { %v467_v63 = vpop.xlane.xlu1 %466 }
 0x1dc   : > { %v473_v2 = vmul.f32 0.00390625, %v467_v63  ;;  %v675_v63 = vld [vmem:[#allocation8 + $0x5a0] sm:$0xff] }
 0x1dd   : > { %v472_v5 = vpop.xlane.xlu2 %471 }
 0x1de   : > { %v474_v8 = vmul.f32 0.00390625, %v472_v5  ;;  %v475_v9 = vmul.f32 %v473_v2, %v473_v2  ;;  %v478_v19 = vsub.f32 %v1596_v47, %v473_v2  ;;  %v479_v20 = vsub.f32 %v1600_v57, %v473_v2  ;;  %v611_v47 = vld [vmem:[#allocation8 + $0x3a0] sm:$0xff]  ;;  %v668_v5 = vld [vmem:[#allocation8 + $0x568] sm:$0xff] }
 0x1df   : > { %v739_v57 = vld [vmem:[#allocation8 + $0x7a0] sm:$0xff] }
 0x1e0   : > { %v476_v10 = vsub.f32 %v474_v8, %v475_v9  ;;  %v539_v2 = vld [vmem:[#allocation8 + $0x160] sm:$0xff]  ;;  %v532_v8 = vld [vmem:[#allocation8 + $0x128] sm:$0xff] }
 0x1e1   : > { %v660_v9 = vld [vmem:[#allocation8 + $0x528] sm:$0xff] }
 0x1e2   : > { %v477_v11 = vmax.f32 %v476_v10, 0.0  ;;  %v523_v10 = vld [vmem:[#allocation8 + $0xe0] sm:$0xff] }
 0x1e4   : > { %v480_v12 = vadd.f32 1e-05, %v477_v11  ;;  %v651_v11 = vld [vmem:[#allocation8 + $0x4e0] sm:$0xff] }
 0x1e6   : > { %1288 = vrsqrt.f32 %v480_v12  ;;  %vm487_vm8 = vweird.f32 %v480_v12 }
 0x1ec   : > { %v1289_v13 = vpop.eup %1288 }
 0x1ed   : > { %v482_v14 = vmul.f32 %v1289_v13, %v480_v12  ;;  %vm488_vm7 = vweird.f32 %v1289_v13  ;;  %v524_v12 = vld [vmem:[#allocation8 + $0xe8] sm:$0xff] }
 0x1ee   : > { %vm489_vm9 = vmor %vm487_vm8, %vm488_vm7 }
 0x1ef   : > { %v483_v15 = vmul.f32 %v1289_v13, %v482_v14  ;;  %v515_v14 = vld [vmem:[#allocation8 + $0xa0] sm:$0xff] }
 0x1f1   : > { %v484_v16 = vmul.f32 0.5, %v483_v15  ;;  %v643_v15 = vld [vmem:[#allocation8 + $0x4a0] sm:$0xff] }
 0x1f3   : > { %v485_v17 = vsub.f32 1.5, %v484_v16  ;;  %v516_v16 = vld [vmem:[#allocation8 + $0xa8] sm:$0xff] }
 0x1f5   : > { %v486_v18 = vmul.f32 %v1289_v13, %v485_v17  ;;  %v644_v17 = vld [vmem:[#allocation8 + $0x4a8] sm:$0xff] }
 0x1f7   : > { %v490_v21 = vsel %vm489_vm9, %v1289_v13, %v486_v18  ;;  %v652_v13 = vld [vmem:[#allocation8 + $0x4e8] sm:$0xff]  ;;  %v507_v18 = vld [vmem:[#allocation8 + $0x60] sm:$0xff] }
 0x1f8   : > { %v491_v22 = vmul.f32 %v490_v21, %v478_v19  ;;  %v492_v23 = vmul.f32 %v490_v21, %v479_v20  ;;  %v635_v19 = vld [vmem:[#allocation8 + $0x460] sm:$0xff]  ;;  %v508_v20 = vld [vmem:[#allocation8 + $0x68] sm:$0xff] }
 0x1f9   : > { %v636_v21 = vld [vmem:[#allocation8 + $0x468] sm:$0xff] }
 0x1fa   : > { %v1608_v24 = vmax.f32 %v491_v22, 0.0  ;;  %v1610_v25 = vmax.f32 %v492_v23, 0.0  ;;  %v499_v22 = vld [vmem:[#allocation8 + $0x20] sm:$0xff] }
 0x1fb   : > { %v627_v23 = vld [vmem:[#allocation8 + $0x420] sm:$0xff] }
 0x1fc   : > { %767 = vmatmul.f32.vlgmr.msra.gmra.mxu2 %v1608_v24  ;;  %787 = vmatmul.f32.vlgmr.msra.gmra.mxu3 %v1610_v25 }
 0x1fd   : > { %807 = vmatmul.f32.vlgmr.msrb.gmra.mxu0 %v1608_v24  ;;  %827 = vmatmul.f32.vlgmr.msrb.gmra.mxu1 %v1610_v25 }
 0x1fe   : > { %911 = vmatpush.msra.mxu2 %v619_v26  ;;  %931 = vmatpush.msra.mxu3 %v747_v27  ;;  %v500_v26 = vld [vmem:[#allocation8 + $0x28] sm:$0xff] }
 0x1ff   : > { %951 = vmatpush.msrb.mxu0 %v620_v28  ;;  %971 = vmatpush.msrb.mxu1 %v748_v29  ;;  %v628_v27 = vld [vmem:[#allocation8 + $0x428] sm:$0xff]  ;;  %v621_v28 = vld [vmem:[#allocation8 + $0x3f0] sm:$0xff] }
 0x200   : > { %912 = vmatpush.msra.mxu2 %v611_v47  ;;  %932 = vmatpush.msra.mxu3 %v739_v57  ;;  %v749_v29 = vld [vmem:[#allocation8 + $0x7f0] sm:$0xff]  ;;  %v622_v47 = vld [vmem:[#allocation8 + $0x3f8] sm:$0xff] }
 0x201   : > { %952 = vmatpush.msrb.mxu0 %v612_v30  ;;  %972 = vmatpush.msrb.mxu1 %v740_v31  ;;  %v750_v57 = vld [vmem:[#allocation8 + $0x7f8] sm:$0xff]  ;;  %v613_v30 = vld [vmem:[#allocation8 + $0x3b0] sm:$0xff] }
 0x202   : > { %913 = vmatpush.msra.mxu2 %v603_v32  ;;  %933 = vmatpush.msra.mxu3 %v731_v33  ;;  %v741_v31 = vld [vmem:[#allocation8 + $0x7b0] sm:$0xff]  ;;  %v614_v32 = vld [vmem:[#allocation8 + $0x3b8] sm:$0xff] }
 0x203   : > { %953 = vmatpush.msrb.mxu0 %v604_v34  ;;  %973 = vmatpush.msrb.mxu1 %v732_v35  ;;  %v742_v33 = vld [vmem:[#allocation8 + $0x7b8] sm:$0xff]  ;;  %v605_v34 = vld [vmem:[#allocation8 + $0x370] sm:$0xff] }
 0x204   : > { %914 = vmatpush.msra.mxu2 %v595_v36  ;;  %934 = vmatpush.msra.mxu3 %v723_v37  ;;  %v733_v35 = vld [vmem:[#allocation8 + $0x770] sm:$0xff]  ;;  %v606_v36 = vld [vmem:[#allocation8 + $0x378] sm:$0xff] }
 0x205   : > { %954 = vmatpush.msrb.mxu0 %v596_v38  ;;  %974 = vmatpush.msrb.mxu1 %v724_v39  ;;  %v734_v37 = vld [vmem:[#allocation8 + $0x778] sm:$0xff]  ;;  %v597_v38 = vld [vmem:[#allocation8 + $0x330] sm:$0xff] }
 0x206   : > { %847 = vmatmul.f32.vlgmr.msrb.gmra.mxu2 %v1608_v24  ;;  %867 = vmatmul.f32.vlgmr.msrb.gmra.mxu3 %v1610_v25  ;;  %v725_v39 = vld [vmem:[#allocation8 + $0x730] sm:$0xff] }
 0x207   : > { %887 = vmatmul.f32.vlgmr.msra.gmra.mxu0 %v1608_v24  ;;  %907 = vmatmul.f32.vlgmr.msra.gmra.mxu1 %v1610_v25 }
 0x208   : > { %915 = vmatpush.msra.mxu2 %v587_v40  ;;  %935 = vmatpush.msra.mxu3 %v715_v41  ;;  %v598_v40 = vld [vmem:[#allocation8 + $0x338] sm:$0xff] }
 0x209   : > { %955 = vmatpush.msrb.mxu0 %v588_v42  ;;  %975 = vmatpush.msrb.mxu1 %v716_v43  ;;  %v726_v41 = vld [vmem:[#allocation8 + $0x738] sm:$0xff]  ;;  %v589_v42 = vld [vmem:[#allocation8 + $0x2f0] sm:$0xff] }
 0x20a   : > { %916 = vmatpush.msra.mxu2 %v579_v44  ;;  %936 = vmatpush.msra.mxu3 %v707_v45  ;;  %v717_v43 = vld [vmem:[#allocation8 + $0x6f0] sm:$0xff]  ;;  %v590_v44 = vld [vmem:[#allocation8 + $0x2f8] sm:$0xff] }
 0x20b   : > { %956 = vmatpush.msrb.mxu0 %v580_v46  ;;  %976 = vmatpush.msrb.mxu1 %v708_v48  ;;  %v718_v45 = vld [vmem:[#allocation8 + $0x6f8] sm:$0xff]  ;;  %v581_v46 = vld [vmem:[#allocation8 + $0x2b0] sm:$0xff] }
 0x20c   : > { %917 = vmatpush.msra.mxu2 %v571_v49  ;;  %937 = vmatpush.msra.mxu3 %v699_v50  ;;  %v709_v48 = vld [vmem:[#allocation8 + $0x6b0] sm:$0xff]  ;;  %v582_v49 = vld [vmem:[#allocation8 + $0x2b8] sm:$0xff] }
 0x20d   : > { %957 = vmatpush.msrb.mxu0 %v572_v51  ;;  %977 = vmatpush.msrb.mxu1 %v700_v52  ;;  %v710_v50 = vld [vmem:[#allocation8 + $0x6b8] sm:$0xff]  ;;  %v573_v51 = vld [vmem:[#allocation8 + $0x270] sm:$0xff] }
 0x20e   : > { %918 = vmatpush.msra.mxu2 %v563_v53  ;;  %938 = vmatpush.msra.mxu3 %v691_v54  ;;  %v701_v52 = vld [vmem:[#allocation8 + $0x670] sm:$0xff]  ;;  %v574_v53 = vld [vmem:[#allocation8 + $0x278] sm:$0xff] }
 0x20f   : > { %958 = vmatpush.msrb.mxu0 %v564_v55  ;;  %978 = vmatpush.msrb.mxu1 %v692_v56  ;;  %v702_v54 = vld [vmem:[#allocation8 + $0x678] sm:$0xff]  ;;  %v565_v55 = vld [vmem:[#allocation8 + $0x230] sm:$0xff] }
 0x210   : > { %919 = vmatpush.msra.mxu2 %v555_v58  ;;  %939 = vmatpush.msra.mxu3 %v683_v59  ;;  %v693_v56 = vld [vmem:[#allocation8 + $0x630] sm:$0xff]  ;;  %v566_v58 = vld [vmem:[#allocation8 + $0x238] sm:$0xff] }
 0x211   : > { %959 = vmatpush.msrb.mxu0 %v556_v60  ;;  %979 = vmatpush.msrb.mxu1 %v684_v61  ;;  %v694_v59 = vld [vmem:[#allocation8 + $0x638] sm:$0xff]  ;;  %v557_v60 = vld [vmem:[#allocation8 + $0x1f0] sm:$0xff] }
 0x212   : > { %920 = vmatpush.msra.mxu2 %v547_v62  ;;  %940 = vmatpush.msra.mxu3 %v675_v63  ;;  %v685_v61 = vld [vmem:[#allocation8 + $0x5f0] sm:$0xff]  ;;  %v558_v62 = vld [vmem:[#allocation8 + $0x1f8] sm:$0xff] }
 0x213   : > { %960 = vmatpush.msrb.mxu0 %v548_v0  ;;  %980 = vmatpush.msrb.mxu1 %v676_v1  ;;  %v686_v63 = vld [vmem:[#allocation8 + $0x5f8] sm:$0xff]  ;;  %v549_v0 = vld [vmem:[#allocation8 + $0x1b0] sm:$0xff] }
 0x214   : > { %921 = vmatpush.msra.mxu2 %v539_v2  ;;  %941 = vmatpush.msra.mxu3 %v667_v3  ;;  %v677_v1 = vld [vmem:[#allocation8 + $0x5b0] sm:$0xff]  ;;  %v550_v2 = vld [vmem:[#allocation8 + $0x1b8] sm:$0xff] }
 0x215   : > { %961 = vmatpush.msrb.mxu0 %v540_v4  ;;  %981 = vmatpush.msrb.mxu1 %v668_v5  ;;  %v678_v3 = vld [vmem:[#allocation8 + $0x5b8] sm:$0xff]  ;;  %v541_v4 = vld [vmem:[#allocation8 + $0x170] sm:$0xff] }
 0x216   : > { %922 = vmatpush.msra.mxu2 %v531_v6  ;;  %942 = vmatpush.msra.mxu3 %v659_v7  ;;  %v669_v5 = vld [vmem:[#allocation8 + $0x570] sm:$0xff]  ;;  %v542_v6 = vld [vmem:[#allocation8 + $0x178] sm:$0xff] }
 0x217   : > { %962 = vmatpush.msrb.mxu0 %v532_v8  ;;  %982 = vmatpush.msrb.mxu1 %v660_v9  ;;  %v670_v7 = vld [vmem:[#allocation8 + $0x578] sm:$0xff]  ;;  %v533_v8 = vld [vmem:[#allocation8 + $0x130] sm:$0xff] }
 0x218   : > { %923 = vmatpush.msra.mxu2 %v523_v10  ;;  %943 = vmatpush.msra.mxu3 %v651_v11  ;;  %v661_v9 = vld [vmem:[#allocation8 + $0x530] sm:$0xff]  ;;  %v534_v10 = vld [vmem:[#allocation8 + $0x138] sm:$0xff] }
 0x219   : > { %963 = vmatpush.msrb.mxu0 %v524_v12  ;;  %983 = vmatpush.msrb.mxu1 %v652_v13  ;;  %v662_v11 = vld [vmem:[#allocation8 + $0x538] sm:$0xff]  ;;  %v525_v12 = vld [vmem:[#allocation8 + $0xf0] sm:$0xff] }
 0x21a   : > { %924 = vmatpush.msra.mxu2 %v515_v14  ;;  %944 = vmatpush.msra.mxu3 %v643_v15  ;;  %v653_v13 = vld [vmem:[#allocation8 + $0x4f0] sm:$0xff]  ;;  %v526_v14 = vld [vmem:[#allocation8 + $0xf8] sm:$0xff] }
 0x21b   : > { %964 = vmatpush.msrb.mxu0 %v516_v16  ;;  %984 = vmatpush.msrb.mxu1 %v644_v17  ;;  %v654_v15 = vld [vmem:[#allocation8 + $0x4f8] sm:$0xff]  ;;  %v517_v16 = vld [vmem:[#allocation8 + $0xb0] sm:$0xff] }
 0x21c   : > { %925 = vmatpush.msra.mxu2 %v507_v18  ;;  %945 = vmatpush.msra.mxu3 %v635_v19  ;;  %v645_v17 = vld [vmem:[#allocation8 + $0x4b0] sm:$0xff]  ;;  %v518_v18 = vld [vmem:[#allocation8 + $0xb8] sm:$0xff] }
 0x21d   : > { %965 = vmatpush.msrb.mxu0 %v508_v20  ;;  %985 = vmatpush.msrb.mxu1 %v636_v21  ;;  %v646_v19 = vld [vmem:[#allocation8 + $0x4b8] sm:$0xff]  ;;  %v509_v20 = vld [vmem:[#allocation8 + $0x70] sm:$0xff] }
 0x21e   : > { %926 = vmatpush.msra.mxu2 %v499_v22  ;;  %946 = vmatpush.msra.mxu3 %v627_v23  ;;  %v637_v21 = vld [vmem:[#allocation8 + $0x470] sm:$0xff]  ;;  %v510_v22 = vld [vmem:[#allocation8 + $0x78] sm:$0xff] }
 0x21f   : > { %966 = vmatpush.msrb.mxu0 %v500_v26  ;;  %986 = vmatpush.msrb.mxu1 %v628_v27  ;;  %v638_v23 = vld [vmem:[#allocation8 + $0x478] sm:$0xff]  ;;  %v501_v26 = vld [vmem:[#allocation8 + $0x30] sm:$0xff] }
 0x220   : > { %927 = vmatmul.f32.vlgmr.msra.gmra.mxu2 %v1608_v24  ;;  %947 = vmatmul.f32.vlgmr.msra.gmra.mxu3 %v1610_v25  ;;  %v629_v27 = vld [vmem:[#allocation8 + $0x430] sm:$0xff] }
 0x221   : > { %967 = vmatmul.f32.vlgmr.msrb.gmra.mxu0 %v1608_v24  ;;  %987 = vmatmul.f32.vlgmr.msrb.gmra.mxu1 %v1610_v25 }
 0x222   : > { %991 = vmatpush.msrb.mxu2 %v621_v28  ;;  %1011 = vmatpush.msrb.mxu3 %v749_v29  ;;  %v502_v28 = vld [vmem:[#allocation8 + $0x38] sm:$0xff] }
 0x223   : > { %1031 = vmatpush.msra.mxu0 %v622_v47  ;;  %1051 = vmatpush.msra.mxu1 %v750_v57  ;;  %v630_v29 = vld [vmem:[#allocation8 + $0x438] sm:$0xff] }
 0x224   : > { %992 = vmatpush.msrb.mxu2 %v613_v30  ;;  %1012 = vmatpush.msrb.mxu3 %v741_v31 }
 0x225   : > { %1032 = vmatpush.msra.mxu0 %v614_v32  ;;  %1052 = vmatpush.msra.mxu1 %v742_v33 }
 0x226   : > { %993 = vmatpush.msrb.mxu2 %v605_v34  ;;  %1013 = vmatpush.msrb.mxu3 %v733_v35 }
 0x227   : > { %1033 = vmatpush.msra.mxu0 %v606_v36  ;;  %1053 = vmatpush.msra.mxu1 %v734_v37 }
 0x228   : > { %994 = vmatpush.msrb.mxu2 %v597_v38  ;;  %1014 = vmatpush.msrb.mxu3 %v725_v39 }
 0x229   : > { %1034 = vmatpush.msra.mxu0 %v598_v40  ;;  %1054 = vmatpush.msra.mxu1 %v726_v41 }
 0x22a   : > { %995 = vmatpush.msrb.mxu2 %v589_v42  ;;  %1015 = vmatpush.msrb.mxu3 %v717_v43 }
 0x22b   : > { %1035 = vmatpush.msra.mxu0 %v590_v44  ;;  %1055 = vmatpush.msra.mxu1 %v718_v45 }
 0x22c   : > { %996 = vmatpush.msrb.mxu2 %v581_v46  ;;  %1016 = vmatpush.msrb.mxu3 %v709_v48 }
 0x22d   : > { %1036 = vmatpush.msra.mxu0 %v582_v49  ;;  %1056 = vmatpush.msra.mxu1 %v710_v50 }
 0x22e   : > { %997 = vmatpush.msrb.mxu2 %v573_v51  ;;  %1017 = vmatpush.msrb.mxu3 %v701_v52 }
 0x22f   : > { %1037 = vmatpush.msra.mxu0 %v574_v53  ;;  %1057 = vmatpush.msra.mxu1 %v702_v54 }
 0x230   : > { %998 = vmatpush.msrb.mxu2 %v565_v55  ;;  %1018 = vmatpush.msrb.mxu3 %v693_v56 }
 0x231   : > { %1038 = vmatpush.msra.mxu0 %v566_v58  ;;  %1058 = vmatpush.msra.mxu1 %v694_v59 }
 0x232   : > { %999 = vmatpush.msrb.mxu2 %v557_v60  ;;  %1019 = vmatpush.msrb.mxu3 %v685_v61 }
 0x233   : > { %1039 = vmatpush.msra.mxu0 %v558_v62  ;;  %1059 = vmatpush.msra.mxu1 %v686_v63 }
 0x234   : > { %1000 = vmatpush.msrb.mxu2 %v549_v0  ;;  %1020 = vmatpush.msrb.mxu3 %v677_v1 }
 0x235   : > { %1040 = vmatpush.msra.mxu0 %v550_v2  ;;  %1060 = vmatpush.msra.mxu1 %v678_v3 }
 0x236   : > { %1001 = vmatpush.msrb.mxu2 %v541_v4  ;;  %1021 = vmatpush.msrb.mxu3 %v669_v5 }
 0x237   : > { %1041 = vmatpush.msra.mxu0 %v542_v6  ;;  %1061 = vmatpush.msra.mxu1 %v670_v7 }
 0x238   : > { %1002 = vmatpush.msrb.mxu2 %v533_v8  ;;  %1022 = vmatpush.msrb.mxu3 %v661_v9 }
 0x239   : > { %1042 = vmatpush.msra.mxu0 %v534_v10  ;;  %1062 = vmatpush.msra.mxu1 %v662_v11 }
 0x23a   : > { %1003 = vmatpush.msrb.mxu2 %v525_v12  ;;  %1023 = vmatpush.msrb.mxu3 %v653_v13 }
 0x23b   : > { %1043 = vmatpush.msra.mxu0 %v526_v14  ;;  %1063 = vmatpush.msra.mxu1 %v654_v15 }
 0x23c   : > { %1004 = vmatpush.msrb.mxu2 %v517_v16  ;;  %1024 = vmatpush.msrb.mxu3 %v645_v17 }
 0x23d   : > { %1044 = vmatpush.msra.mxu0 %v518_v18  ;;  %1064 = vmatpush.msra.mxu1 %v646_v19 }
 0x23e   : > { %1005 = vmatpush.msrb.mxu2 %v509_v20  ;;  %1025 = vmatpush.msrb.mxu3 %v637_v21 }
 0x23f   : > { %1045 = vmatpush.msra.mxu0 %v510_v22  ;;  %1065 = vmatpush.msra.mxu1 %v638_v23 }
 0x240   : > { %1006 = vmatpush.msrb.mxu2 %v501_v26  ;;  %1026 = vmatpush.msrb.mxu3 %v629_v27 }
 0x241   : > { %1046 = vmatpush.msra.mxu0 %v502_v28  ;;  %1066 = vmatpush.msra.mxu1 %v630_v29 }
 0x242   : > { %1007 = vmatmul.f32.vlgmr.msrb.gmra.mxu2 %v1608_v24  ;;  %1027 = vmatmul.f32.vlgmr.msrb.gmra.mxu3 %v1610_v25 }
 0x243   : > { %1047 = vmatmul.f32.vlgmr.msra.gmra.mxu0 %v1608_v24  ;;  %1067 = vmatmul.f32.vlgmr.msra.gmra.mxu1 %v1610_v25 }
 0x27a   : > { %v808_v47 = vpop.f32.mrf.mxu0  ;;  %v828_v57 = vpop.f32.mrf.mxu1 }
 0x27b   : > { %v829_v30 = vadd.f32 %v828_v57, %v808_v47 }
 0x27d   : > { %1072 = vst [vmem:[%s1629_s5 + $0x8] sm:$0xff] %v829_v30 }
 0x27f   : > { %v768_v31 = vpop.f32.mrf.mxu2  ;;  %v788_v32 = vpop.f32.mrf.mxu3 }
 0x280   : > { %v789_v33 = vadd.f32 %v788_v32, %v768_v31 }
 0x282   : > { %1071 = vst [vmem:[%s1629_s5] sm:$0xff] %v789_v33 }
 0x284   : > { %v888_v24 = vpop.f32.mrf.mxu0  ;;  %v908_v25 = vpop.f32.mrf.mxu1 }
 0x285   : > { %v909_v34 = vadd.f32 %v908_v25, %v888_v24 }
 0x287   : > { %1074 = vst [vmem:[%s1629_s5 + $0x18] sm:$0xff] %v909_v34 }
 0x289   : > { %v848_v35 = vpop.f32.mrf.mxu2  ;;  %v868_v36 = vpop.f32.mrf.mxu3 }
 0x28a   : > { %v869_v37 = vadd.f32 %v868_v36, %v848_v35 }
 0x28c   : > { %1073 = vst [vmem:[%s1629_s5 + $0x10] sm:$0xff] %v869_v37 }
 0x29e   : > { %v968_v38 = vpop.f32.mrf.mxu0  ;;  %v988_v39 = vpop.f32.mrf.mxu1 }
 0x29f   : > { %v989_v40 = vadd.f32 %v988_v39, %v968_v38 }
 0x2a1   : > { %1076 = vst [vmem:[%s1629_s5 + $0x28] sm:$0xff] %v989_v40 }
 0x2a3   : > { %v928_v41 = vpop.f32.mrf.mxu2  ;;  %v948_v42 = vpop.f32.mrf.mxu3 }
 0x2a4   : > { %v949_v43 = vadd.f32 %v948_v42, %v928_v41 }
 0x2a6   : > { %1075 = vst [vmem:[%s1629_s5 + $0x20] sm:$0xff] %v949_v43 }
 0x2c0   : > { %v1048_v44 = vpop.f32.mrf.mxu0  ;;  %v1068_v45 = vpop.f32.mrf.mxu1 }
 0x2c1   : > { %v1069_v46 = vadd.f32 %v1068_v45, %v1048_v44 }
 0x2c3   : > { %1078 = vst [vmem:[%s1629_s5 + $0x38] sm:$0xff] %v1069_v46 }
 0x2c5   : > { %v1008_v48 = vpop.f32.mrf.mxu2  ;;  %v1028_v49 = vpop.f32.mrf.mxu3 }
 0x2c6   : > { %v1029_v50 = vadd.f32 %v1028_v49, %v1008_v48 }
 0x2c8   : > { %1077 = vst [vmem:[%s1629_s5 + $0x30] sm:$0xff] %v1029_v50 }
 0x2c9   : > { %1407 = shalt.err (!%p1404_p11)
}
 0x2ca   : > { %1219 = dma.vmem_to_hbm [thread:$0]  (%p1555_p5), %s1094_s21, 1024, %s1096_s22, %s1080_s24  }
 0x2cb PF: > { %s1107_s11 = sand.u32 1, %s1438_s12   ;;  %p1682_p12 = scmp.ge.s32.totalorder %s1450_s15, 2 }
 0x2cc   : > { %s1108_s29 = scalar_lea.sflag [#allocation5], %s1107_s11 }
 0x2cd   : > { %p1233_p13 = pnand %p1682_p12, %p1521_p6 }
 0x2cf   : > { %p1234_p0 = pneg %p1233_p13 }
 0x2d1   : > { %1433 = dma.done.wait (%p1234_p0), %s1108_s29, 1024  }
 0x2d2   : > { %1435 = vsyncadd (%p1234_p0), %s1108_s29, 4294966272  ;;  %p17_p3 = scmp.ge.s32.totalorder %s1542_s6, 4   ;;  %s1683_s12 = smov %s1442_s13 }
 0x2d3   : > { %s1684_s13 = smov %s1446_s14  ;;  %s1685_s14 = smov %s1551_s9 }
 0x2d4   : > { %s1686_s15 = smov %s1542_s6  ;;  %19 = sbr.rel (!%p17_p3) target bundleno = 6 (0x6), region = 88 }
 0x2d9   :  { %1114 = vsyncpa [#allocation4], 1 }
 0x2da   :  { %1116 = vsyncpa [#allocation4 + $0x1], 1 }
 0x2db   :  { %1117 = vsyncpa [#allocation7], 1 }
 0x2dc   :  { %1118 = vsyncpa [#allocation5], 1 }
 0x2dd   :  { %1120 = vsyncpa [#allocation5 + $0x1], 1 }

</bundles_post_ra>
